<compile_context>
chip_gen: v7x
topology: tpu7x:2x2x1
jax: 0.10.0
libtpu: 0.0.40
codegen_flags: <defaults>
</compile_context>

<pallas_src>
import jax
import jax.numpy as jnp
from jax.experimental import pallas as pl
from jax.experimental.pallas import tpu as pltpu


def _round_up(v: int, m: int) -> int:
    return (v + m - 1) // m * m


def _vmem_capacity_bytes() -> int:
    """Physical VMEM per TensorCore (generation-aware, conservative fallback)."""
    try:
        info = pltpu.get_tpu_info()
        cap = getattr(info, "vmem_capacity_bytes", None)
        if cap:
            return int(cap)
    except Exception:
        pass
    return 64 * 1024 * 1024  # v7x per-TC VMEM: a safe lower bound for any chip


def _additive_attention_kernel(x_ref, mask_ref, w1_ref, b1_ref, w2_ref, b2_ref,
                               out_ref):
    # x_ref:    (TB*S, D)  flattened (batch, candidate) rows, input dtype
    # mask_ref: (TB*S, 1)  f32 (all-ones when attn_mask is None)
    # w1_ref:   (D, Hp)    att_fc1 weight, compute dtype (padded cols are 0)
    # b1_ref:   (1, Hp)    att_fc1 bias,   compute dtype
    # w2_ref:   (1, Hp)    att_fc2 weight as a row, compute dtype
    # b2_ref:   (1, 1)     att_fc2 bias, f32
    # out_ref:  (TB, D)
    tbs, d = x_ref.shape
    tb = out_ref.shape[0]
    s = tbs // tb
    cdt = w1_ref.dtype                           # compute dtype (f32 or bf16)

    x = x_ref[...]                               # (TB*S, D)

    # --- att_fc1 + tanh: ONE fused MXU matmul (M = TB*S) + EUP tanh ---------
    e = jnp.tanh(
        jnp.dot(x.astype(cdt), w1_ref[...], preferred_element_type=cdt)
        + b1_ref[...])                                           # (TB*S, Hp)

    # --- att_fc2 (H -> 1): VPU multiply + f32 lane reduce (no N=1 matmul) ---
    score = (jnp.sum((e * w2_ref[...]).astype(jnp.float32),
                     axis=-1, keepdims=True)
             + b2_ref[...])                                      # (TB*S, 1)

    # exp with no max-subtraction, exactly like the PyTorch module.  Bounded
    # here because tanh output is in [-1, 1] so |score| <= ||W2||_1 + |b2|;
    # for very large W2 scales this can overflow f32 (as does the reference).
    alpha = jnp.exp(score) * mask_ref[...]                       # (TB*S, 1) f32

    # --- weighted pooling over S: f32 accumulation, no loop-carried vregs ---
    wx = alpha * x.astype(jnp.float32)                           # (TB*S, D)
    pooled = jnp.sum(wx.reshape(tb, s, d), axis=1)               # (TB, D)
    denom = jnp.sum(alpha.reshape(tb, s, 1), axis=1)             # (TB, 1)

    # Approx reciprocal: EUP slot, ~2^-12 relative error (well inside test
    # tolerance; swap for exact division if bit-parity with torch matters).
    inv = pl.reciprocal(denom + 1e-8, approx=True)
    out_ref[...] = (pooled * inv).astype(out_ref.dtype)


def additive_attention(x, w1, b1, w2, b2, attn_mask=None, *,
                       batch_tile=256, compute_dtype=None):
    """Attention pooling (AdditiveAttention.forward).

    x: (B, S, D); w1: (D, H); b1: (H,); w2: (H, 1); b2: (1,) or scalar;
    attn_mask: (B, S) or None.  Returns (B, D) in x.dtype.

    compute_dtype: dtype for the att_fc1 matmul operands and the H-sized
      elementwise ops (tanh, e*W2).  Default float32.  On v6e/v7x pass
      jnp.bfloat16 for ~2x on the binding VPU/EUP slots; keep the f32 default
      on v5e (no bf16 VPU/EUP datapath).  exp / normalization / pooling
      accumulation always stay float32.
    """
    B, S, D = x.shape
    H = w1.shape[1]
    out_dtype = x.dtype
    cdt = jnp.dtype(compute_dtype) if compute_dtype is not None else jnp.dtype(jnp.float32)

    Hp = _round_up(H, 128)          # lane-dense hidden dim (padded cols are inert zeros)
    LANE = 128
    Dl = _round_up(D, LANE)         # lane-padded *footprint* of D (no data padding!)
    x_itemsize = jnp.dtype(x.dtype).itemsize
    out_itemsize = jnp.dtype(out_dtype).itemsize
    c_itemsize = cdt.itemsize

    # ---- free views / tiny host-side prep (no padded or re-cast copy of x) --
    x2 = x.reshape(B * S, D)                                   # contiguous -> free
    if attn_mask is None:
        mask2 = jnp.ones((B * S, 1), jnp.float32)
    else:
        mask2 = attn_mask.astype(jnp.float32).reshape(B * S, 1)

    w1_p = jnp.pad(jnp.asarray(w1, jnp.float32), ((0, 0), (0, Hp - H))).astype(cdt)
    b1_p = jnp.pad(jnp.asarray(b1, jnp.float32).reshape(-1), (0, Hp - H)).reshape(1, Hp).astype(cdt)
    w2_p = jnp.pad(jnp.asarray(w2, jnp.float32).reshape(-1), (0, Hp - H)).reshape(1, Hp).astype(cdt)
    b2_p = jnp.asarray(b2, jnp.float32).reshape(1, 1)

    # ---- VMEM estimate (counts the big `e` intermediate and the mask block) -
    def est_vmem(tb):
        rows = tb * S
        x_blk = 2 * rows * Dl * x_itemsize            # double-buffered x block
        m_blk = 2 * rows * LANE * 4                   # (rows, 1) f32 mask block
        o_blk = 2 * tb * Dl * out_itemsize            # double-buffered out block
        w_blk = 2 * (_round_up(D, 8) * Hp * c_itemsize
                     + 2 * 8 * Hp * c_itemsize + 8 * LANE * 4)
        tmp = (3 * rows * Hp * c_itemsize             # e, e*W2, headroom
               + 2 * rows * LANE * 4                  # score / alpha (lane-padded)
               + 2 * rows * Dl * 4)                   # wx + f32 view of x
        return x_blk + m_blk + o_blk + w_blk + tmp

    # ---- batch tile selection ------------------------------------------------
    TB = max(8, min(_round_up(batch_tile, 8), _round_up(B, 8)))
    # v7x: two TensorCores share the "parallel" batch grid -> prefer >= 2 steps.
    while TB > 8 and pl.cdiv(B, TB) < 2:
        TB = max(8, _round_up(TB // 2, 8))

    VMEM_CAP = _vmem_capacity_bytes()
    VMEM_LIMIT_CAP = (3 * VMEM_CAP) // 4      # ~48 MiB on v7x, ~96 MiB on v5e/v6e
    VMEM_BUDGET = max(16 << 20, VMEM_LIMIT_CAP - (12 << 20))
    while TB > 8 and est_vmem(TB) > VMEM_BUDGET:
        TB = max(8, _round_up(TB // 2, 8))

    grid = (pl.cdiv(B, TB),)
    est = est_vmem(TB)
    vmem_limit = int(min(VMEM_LIMIT_CAP, max(32 << 20, _round_up(2 * est, 1 << 20))))

    def call(single_buffer_weights):
        # Weight/bias blocks never change across grid steps -> single-buffer
        # them to save VMEM (matters for large D, H under v7x's 64 MiB/TC).
        wkw = dict(pipeline_mode=pl.Buffered(1)) if single_buffer_weights else {}
        grid_spec = pltpu.PrefetchScalarGridSpec(
            num_scalar_prefetch=0,
            grid=grid,
            in_specs=[
                pl.BlockSpec((TB * S, D), lambda b: (b, 0)),        # x rows
                pl.BlockSpec((TB * S, 1), lambda b: (b, 0)),        # mask rows
                pl.BlockSpec((D, Hp), lambda b: (0, 0), **wkw),     # W1 (resident)
                pl.BlockSpec((1, Hp), lambda b: (0, 0), **wkw),     # b1
                pl.BlockSpec((1, Hp), lambda b: (0, 0), **wkw),     # W2 row
                pl.BlockSpec((1, 1), lambda b: (0, 0), **wkw),      # b2
            ],
            out_specs=pl.BlockSpec((TB, D), lambda b: (b, 0)),
        )
        return pl.pallas_call(
            _additive_attention_kernel,
            out_shape=jax.ShapeDtypeStruct((B, D), out_dtype),
            grid_spec=grid_spec,
            compiler_params=pltpu.CompilerParams(
                dimension_semantics=("parallel",),   # multi-TC chips split the batch
                vmem_limit_bytes=vmem_limit,
            ),
        )(x2, mask2, w1_p, b1_p, w2_p, b2_p)

    try:
        return call(True)
    except Exception:
        # pl.Buffered(1) not supported by this Pallas build -> default buffering.
        return call(False)


def _reference(x, w1, b1, w2, b2, attn_mask):
    e = jnp.tanh(x @ w1 + b1)                        # (B, S, H)
    alpha = jnp.exp(e @ w2 + b2)                     # (B, S, 1)
    alpha = alpha * attn_mask[..., None]
    alpha = alpha / (jnp.sum(alpha, axis=1, keepdims=True) + 1e-8)
    return jnp.einsum("bsd,bs1->bd", x, alpha)


if __name__ == "__main__":
    key = jax.random.PRNGKey(0)
    B, S, D, H = 2, 8, 32, 200      # batch, candidate_size, d_h, hidden_size

    (k_x, k_m, k_w1, k_b1, k_w2, k_b2, k_x2, k_m2) = jax.random.split(key, 8)
    x = jax.random.normal(k_x, (B, S, D), dtype=jnp.float32)
    attn_mask = (jax.random.uniform(k_m, (B, S)) > 0.2).astype(jnp.float32)

    # nn.Linear-style init for att_fc1 / att_fc2.
    bound1 = 1.0 / (D ** 0.5)
    w1 = jax.random.uniform(k_w1, (D, H), minval=-bound1, maxval=bound1,
                            dtype=jnp.float32)
    b1 = jax.random.uniform(k_b1, (H,), minval=-bound1, maxval=bound1,
                            dtype=jnp.float32)
    bound2 = 1.0 / (H ** 0.5)
    w2 = jax.random.uniform(k_w2, (H, 1), minval=-bound2, maxval=bound2,
                            dtype=jnp.float32)
    b2 = jax.random.uniform(k_b2, (1,), minval=-bound2, maxval=bound2,
                            dtype=jnp.float32)

    # --- float32 path, masked ----------------------------------------------
    out = jax.block_until_ready(additive_attention(x, w1, b1, w2, b2, attn_mask))
    ref = _reference(x, w1, b1, w2, b2, attn_mask)
    assert out.shape == (B, D)
    assert jnp.allclose(out, ref, atol=2e-2, rtol=2e-2), "f32 path mismatch"

    # --- attn_mask=None path -------------------------------------------------
    out_nm = jax.block_until_ready(additive_attention(x, w1, b1, w2, b2, None))
    ref_nm = _reference(x, w1, b1, w2, b2, jnp.ones((B, S), jnp.float32))
    assert jnp.allclose(out_nm, ref_nm, atol=2e-2, rtol=2e-2), "no-mask mismatch"

    # --- multi-step grid + ragged batch tail (B not a multiple of TB) --------
    B2 = 20
    x2 = jax.random.normal(k_x2, (B2, S, D), dtype=jnp.float32)
    mask2 = (jax.random.uniform(k_m2, (B2, S)) > 0.2).astype(jnp.float32)
    out2 = jax.block_until_ready(
        additive_attention(x2, w1, b1, w2, b2, mask2, batch_tile=8))
    ref2 = _reference(x2, w1, b1, w2, b2, mask2)
    assert out2.shape == (B2, D)
    assert jnp.allclose(out2, ref2, atol=2e-2, rtol=2e-2), "tiled path mismatch"

    # --- bf16 compute path (v6e/v7x perf mode) vs bf16-quantized reference ---
    out_bf = jax.block_until_ready(
        additive_attention(x, w1, b1, w2, b2, attn_mask,
                           compute_dtype=jnp.bfloat16))
    xq = x.astype(jnp.bfloat16).astype(jnp.float32)
    w1q = w1.astype(jnp.bfloat16).astype(jnp.float32)
    ref_bf = _reference(xq, w1q, b1, w2, b2, attn_mask)
    assert out_bf.shape == (B, D)
    assert jnp.allclose(out_bf, ref_bf, atol=4e-2, rtol=4e-2), "bf16 path mismatch"

    print("KERNEL_OK")
</pallas_src>

<mosaic_0001>
module attributes {stable_mosaic.version = 11 : i64} {
  func.func @_additive_attention_kernel(%arg0: i32, %arg1: memref<64x32xf32, #tpu.memory_space<vmem>>, %arg2: memref<64x1xf32, #tpu.memory_space<vmem>>, %arg3: memref<32x256xf32, #tpu.memory_space<vmem>>, %arg4: memref<1x256xf32, #tpu.memory_space<vmem>>, %arg5: memref<1x256xf32, #tpu.memory_space<vmem>>, %arg6: memref<1x1xf32, #tpu.memory_space<vmem>>, %arg7: memref<8x32xf32, #tpu.memory_space<vmem>>) attributes {dimension_semantics = [#tpu.dimension_semantics<parallel>], iteration_bounds = array<i64: 1>, scalar_prefetch = 0 : i64, scratch_operands = 0 : i64, tpu.core_type = #tpu.core_type<tc>, window_params = [{transform_indices = @transform_0, window_bounds = array<i64: 64, 32>}, {transform_indices = @transform_1, window_bounds = array<i64: 64, 1>}, {pipeline_mode = #tpu.pipeline_mode<synchronous>, transform_indices = @transform_2, window_bounds = array<i64: 32, 256>}, {pipeline_mode = #tpu.pipeline_mode<synchronous>, transform_indices = @transform_3, window_bounds = array<i64: 1, 256>}, {pipeline_mode = #tpu.pipeline_mode<synchronous>, transform_indices = @transform_4, window_bounds = array<i64: 1, 256>}, {pipeline_mode = #tpu.pipeline_mode<synchronous>, transform_indices = @transform_5, window_bounds = array<i64: 1, 1>}, {transform_indices = @transform_6, window_bounds = array<i64: 8, 32>}]} {
    %c0 = arith.constant 0 : index
    %c0_0 = arith.constant 0 : index
    %0 = vector.load %arg1[%c0, %c0_0] : memref<64x32xf32, #tpu.memory_space<vmem>>, vector<64x32xf32>
    %c0_1 = arith.constant 0 : index
    %c0_2 = arith.constant 0 : index
    %1 = vector.load %arg3[%c0_1, %c0_2] : memref<32x256xf32, #tpu.memory_space<vmem>>, vector<32x256xf32>
    %cst = arith.constant dense<0.000000e+00> : vector<64x256xf32>
    %2 = tpu.matmul %0, %1, %cst {dimension_numbers = #tpu.dot_dimension_numbers<[1], [0], [0], [1], [0, 0, 1, 1], [], []>} : vector<64x32xf32>, vector<32x256xf32>, vector<64x256xf32> -> vector<64x256xf32>
    %c0_3 = arith.constant 0 : index
    %c0_4 = arith.constant 0 : index
    %3 = vector.load %arg4[%c0_3, %c0_4] : memref<1x256xf32, #tpu.memory_space<vmem>>, vector<1x256xf32>
    %4 = vector.broadcast %3 : vector<1x256xf32> to vector<64x256xf32>
    %5 = arith.addf %2, %4 : vector<64x256xf32>
    %6 = math.tanh %5 : vector<64x256xf32>
    %c0_5 = arith.constant 0 : index
    %c0_6 = arith.constant 0 : index
    %7 = vector.load %arg5[%c0_5, %c0_6] : memref<1x256xf32, #tpu.memory_space<vmem>>, vector<1x256xf32>
    %8 = vector.broadcast %7 : vector<1x256xf32> to vector<64x256xf32>
    %9 = arith.mulf %6, %8 : vector<64x256xf32>
    %cst_7 = arith.constant dense<0.000000e+00> : vector<64xf32>
    %10 = vector.multi_reduction <add>, %9, %cst_7 [1] : vector<64x256xf32> to vector<64xf32>
    %11 = vector.shape_cast %10 : vector<64xf32> to vector<64x1xf32>
    %c0_8 = arith.constant 0 : index
    %c0_9 = arith.constant 0 : index
    %12 = vector.load %arg6[%c0_8, %c0_9] : memref<1x1xf32, #tpu.memory_space<vmem>>, vector<1x1xf32>
    %13 = vector.broadcast %12 : vector<1x1xf32> to vector<64x1xf32>
    %14 = arith.addf %11, %13 : vector<64x1xf32>
    %15 = math.exp %14 : vector<64x1xf32>
    %c0_10 = arith.constant 0 : index
    %c0_11 = arith.constant 0 : index
    %16 = vector.load %arg2[%c0_10, %c0_11] : memref<64x1xf32, #tpu.memory_space<vmem>>, vector<64x1xf32>
    %17 = arith.mulf %15, %16 : vector<64x1xf32>
    %18 = vector.broadcast %17 : vector<64x1xf32> to vector<64x32xf32>
    %19 = arith.mulf %18, %0 : vector<64x32xf32>
    %20 = vector.shape_cast %19 : vector<64x32xf32> to vector<8x8x32xf32>
    %cst_12 = arith.constant dense<0.000000e+00> : vector<8x32xf32>
    %21 = vector.multi_reduction <add>, %20, %cst_12 [1] : vector<8x8x32xf32> to vector<8x32xf32>
    %22 = vector.shape_cast %17 : vector<64x1xf32> to vector<8x8x1xf32>
    %cst_13 = arith.constant dense<0.000000e+00> : vector<8x1xf32>
    %23 = vector.multi_reduction <add>, %22, %cst_13 [1] : vector<8x8x1xf32> to vector<8x1xf32>
    %cst_14 = arith.constant 9.99999993E-9 : f32
    %24 = vector.broadcast %cst_14 : f32 to vector<8x1xf32>
    %25 = arith.addf %23, %24 : vector<8x1xf32>
    %26 = tpu.reciprocal %25 {approx = true} : vector<8x1xf32> -> vector<8x1xf32>
    %27 = vector.broadcast %26 : vector<8x1xf32> to vector<8x32xf32>
    %28 = arith.mulf %21, %27 : vector<8x32xf32>
    %c0_15 = arith.constant 0 : index
    %c0_16 = arith.constant 0 : index
    %29 = vector.load %arg7[%c0_15, %c0_16] : memref<8x32xf32, #tpu.memory_space<vmem>>, vector<8x32xf32>
    tpu.vector_store %arg7[%c0_15, %c0_16], %28 {strides = array<i32>} : memref<8x32xf32, #tpu.memory_space<vmem>>, vector<8x32xf32>,
    return
  }
  func.func @transform_0(%arg0: i32) -> (i32, i32) {
    %c0_i32 = arith.constant 0 : i32
    %c0_i32_0 = arith.constant 0 : i32
    return %arg0, %c0_i32 : i32, i32
  }
  func.func @transform_1(%arg0: i32) -> (i32, i32) {
    %c0_i32 = arith.constant 0 : i32
    %c0_i32_0 = arith.constant 0 : i32
    return %arg0, %c0_i32 : i32, i32
  }
  func.func @transform_2(%arg0: i32) -> (i32, i32) {
    %c0_i32 = arith.constant 0 : i32
    %c0_i32_0 = arith.constant 0 : i32
    %c0_i32_1 = arith.constant 0 : i32
    return %c0_i32, %c0_i32_0 : i32, i32
  }
  func.func @transform_3(%arg0: i32) -> (i32, i32) {
    %c0_i32 = arith.constant 0 : i32
    %c0_i32_0 = arith.constant 0 : i32
    %c0_i32_1 = arith.constant 0 : i32
    return %c0_i32, %c0_i32_0 : i32, i32
  }
  func.func @transform_4(%arg0: i32) -> (i32, i32) {
    %c0_i32 = arith.constant 0 : i32
    %c0_i32_0 = arith.constant 0 : i32
    %c0_i32_1 = arith.constant 0 : i32
    return %c0_i32, %c0_i32_0 : i32, i32
  }
  func.func @transform_5(%arg0: i32) -> (i32, i32) {
    %c0_i32 = arith.constant 0 : i32
    %c0_i32_0 = arith.constant 0 : i32
    %c0_i32_1 = arith.constant 0 : i32
    return %c0_i32, %c0_i32_0 : i32, i32
  }
  func.func @transform_6(%arg0: i32) -> (i32, i32) {
    %c0_i32 = arith.constant 0 : i32
    %c0_i32_0 = arith.constant 0 : i32
    return %arg0, %c0_i32 : i32, i32
  }
}

module attributes {stable_mosaic.version = 11 : i64} {
  func.func @_additive_attention_kernel(%arg0: i32, %arg1: memref<64x32xf32, #tpu.memory_space<vmem>>, %arg2: memref<64x1xf32, #tpu.memory_space<vmem>>, %arg3: memref<32x256xf32, #tpu.memory_space<vmem>>, %arg4: memref<1x256xf32, #tpu.memory_space<vmem>>, %arg5: memref<1x256xf32, #tpu.memory_space<vmem>>, %arg6: memref<1x1xf32, #tpu.memory_space<vmem>>, %arg7: memref<8x32xf32, #tpu.memory_space<vmem>>) attributes {dimension_semantics = [#tpu.dimension_semantics<parallel>], iteration_bounds = array<i64: 1>, scalar_prefetch = 0 : i64, scratch_operands = 0 : i64, tpu.core_type = #tpu.core_type<tc>, window_params = [{transform_indices = @transform_0, window_bounds = array<i64: 64, 32>}, {transform_indices = @transform_1, window_bounds = array<i64: 64, 1>}, {pipeline_mode = #tpu.pipeline_mode<synchronous>, transform_indices = @transform_2, window_bounds = array<i64: 32, 256>}, {pipeline_mode = #tpu.pipeline_mode<synchronous>, transform_indices = @transform_3, window_bounds = array<i64: 1, 256>}, {pipeline_mode = #tpu.pipeline_mode<synchronous>, transform_indices = @transform_4, window_bounds = array<i64: 1, 256>}, {pipeline_mode = #tpu.pipeline_mode<synchronous>, transform_indices = @transform_5, window_bounds = array<i64: 1, 1>}, {transform_indices = @transform_6, window_bounds = array<i64: 8, 32>}]} {
    %c0 = arith.constant 0 : index
    %c0_0 = arith.constant 0 : index
    %0 = vector.load %arg1[%c0, %c0_0] : memref<64x32xf32, #tpu.memory_space<vmem>>, vector<64x32xf32>
    %c0_1 = arith.constant 0 : index
    %c0_2 = arith.constant 0 : index
    %1 = vector.load %arg3[%c0_1, %c0_2] : memref<32x256xf32, #tpu.memory_space<vmem>>, vector<32x256xf32>
    %cst = arith.constant dense<0.000000e+00> : vector<64x256xf32>
    %2 = tpu.matmul %0, %1, %cst {dimension_numbers = #tpu.dot_dimension_numbers<[1], [0], [0], [1], [0, 0, 1, 1], [], []>} : vector<64x32xf32>, vector<32x256xf32>, vector<64x256xf32> -> vector<64x256xf32>
    %c0_3 = arith.constant 0 : index
    %c0_4 = arith.constant 0 : index
    %3 = vector.load %arg4[%c0_3, %c0_4] : memref<1x256xf32, #tpu.memory_space<vmem>>, vector<1x256xf32>
    %4 = vector.broadcast %3 : vector<1x256xf32> to vector<64x256xf32>
    %5 = arith.addf %2, %4 : vector<64x256xf32>
    %6 = math.tanh %5 : vector<64x256xf32>
    %c0_5 = arith.constant 0 : index
    %c0_6 = arith.constant 0 : index
    %7 = vector.load %arg5[%c0_5, %c0_6] : memref<1x256xf32, #tpu.memory_space<vmem>>, vector<1x256xf32>
    %8 = vector.broadcast %7 : vector<1x256xf32> to vector<64x256xf32>
    %9 = arith.mulf %6, %8 : vector<64x256xf32>
    %cst_7 = arith.constant dense<0.000000e+00> : vector<64xf32>
    %10 = vector.multi_reduction <add>, %9, %cst_7 [1] : vector<64x256xf32> to vector<64xf32>
    %11 = vector.shape_cast %10 : vector<64xf32> to vector<64x1xf32>
    %c0_8 = arith.constant 0 : index
    %c0_9 = arith.constant 0 : index
    %12 = vector.load %arg6[%c0_8, %c0_9] : memref<1x1xf32, #tpu.memory_space<vmem>>, vector<1x1xf32>
    %13 = vector.broadcast %12 : vector<1x1xf32> to vector<64x1xf32>
    %14 = arith.addf %11, %13 : vector<64x1xf32>
    %15 = math.exp %14 : vector<64x1xf32>
    %c0_10 = arith.constant 0 : index
    %c0_11 = arith.constant 0 : index
    %16 = vector.load %arg2[%c0_10, %c0_11] : memref<64x1xf32, #tpu.memory_space<vmem>>, vector<64x1xf32>
    %17 = arith.mulf %15, %16 : vector<64x1xf32>
    %18 = vector.broadcast %17 : vector<64x1xf32> to vector<64x32xf32>
    %19 = arith.mulf %18, %0 : vector<64x32xf32>
    %20 = vector.shape_cast %19 : vector<64x32xf32> to vector<8x8x32xf32>
    %cst_12 = arith.constant dense<0.000000e+00> : vector<8x32xf32>
    %21 = vector.multi_reduction <add>, %20, %cst_12 [1] : vector<8x8x32xf32> to vector<8x32xf32>
    %22 = vector.shape_cast %17 : vector<64x1xf32> to vector<8x8x1xf32>
    %cst_13 = arith.constant dense<0.000000e+00> : vector<8x1xf32>
    %23 = vector.multi_reduction <add>, %22, %cst_13 [1] : vector<8x8x1xf32> to vector<8x1xf32>
    %cst_14 = arith.constant 9.99999993E-9 : f32
    %24 = vector.broadcast %cst_14 : f32 to vector<8x1xf32>
    %25 = arith.addf %23, %24 : vector<8x1xf32>
    %26 = tpu.reciprocal %25 {approx = true} : vector<8x1xf32> -> vector<8x1xf32>
    %27 = vector.broadcast %26 : vector<8x1xf32> to vector<8x32xf32>
    %28 = arith.mulf %21, %27 : vector<8x32xf32>
    %c0_15 = arith.constant 0 : index
    %c0_16 = arith.constant 0 : index
    %29 = vector.load %arg7[%c0_15, %c0_16] : memref<8x32xf32, #tpu.memory_space<vmem>>, vector<8x32xf32>
    tpu.vector_store %arg7[%c0_15, %c0_16], %28 {strides = array<i32>} : memref<8x32xf32, #tpu.memory_space<vmem>>, vector<8x32xf32>,
    return
  }
  func.func @transform_0(%arg0: i32) -> (i32, i32) {
    %c0_i32 = arith.constant 0 : i32
    %c0_i32_0 = arith.constant 0 : i32
    return %arg0, %c0_i32 : i32, i32
  }
  func.func @transform_1(%arg0: i32) -> (i32, i32) {
    %c0_i32 = arith.constant 0 : i32
    %c0_i32_0 = arith.constant 0 : i32
    return %arg0, %c0_i32 : i32, i32
  }
  func.func @transform_2(%arg0: i32) -> (i32, i32) {
    %c0_i32 = arith.constant 0 : i32
    %c0_i32_0 = arith.constant 0 : i32
    %c0_i32_1 = arith.constant 0 : i32
    return %c0_i32, %c0_i32_0 : i32, i32
  }
  func.func @transform_3(%arg0: i32) -> (i32, i32) {
    %c0_i32 = arith.constant 0 : i32
    %c0_i32_0 = arith.constant 0 : i32
    %c0_i32_1 = arith.constant 0 : i32
    return %c0_i32, %c0_i32_0 : i32, i32
  }
  func.func @transform_4(%arg0: i32) -> (i32, i32) {
    %c0_i32 = arith.constant 0 : i32
    %c0_i32_0 = arith.constant 0 : i32
    %c0_i32_1 = arith.constant 0 : i32
    return %c0_i32, %c0_i32_0 : i32, i32
  }
  func.func @transform_5(%arg0: i32) -> (i32, i32) {
    %c0_i32 = arith.constant 0 : i32
    %c0_i32_0 = arith.constant 0 : i32
    %c0_i32_1 = arith.constant 0 : i32
    return %c0_i32, %c0_i32_0 : i32, i32
  }
  func.func @transform_6(%arg0: i32) -> (i32, i32) {
    %c0_i32 = arith.constant 0 : i32
    %c0_i32_0 = arith.constant 0 : i32
    return %arg0, %c0_i32 : i32, i32
  }
}

</mosaic_0001>

<bundles_post_ra>
// kernel: tpu_custom_call.1
= control target key start
LH: loop header
LB: loop body
LE: loop exit
PB: predicated region body
PF: predicated region fallthrough
CT: control target
= control target key end

     0   :  { %s912_s0 = inlined_call_operand.vmem [shape: f32[16,32], index: 0, kind: input, shape index: {}]   ;;  %s913_s1 = inlined_call_operand.vmem [shape: f32[16,1], index: 1, kind: input, shape index: {}]   ;;  %s914_s2 = inlined_call_operand.hbm [shape: f32[32,256], index: 2, kind: input, shape index: {}]   ;;  %s915_s3 = inlined_call_operand.vmem [shape: f32[1,256], index: 3, kind: input, shape index: {}]   ;;  %s916_s4 = inlined_call_operand.vmem [shape: f32[1,256], index: 4, kind: input, shape index: {}]   ;;  %s917_s5 = inlined_call_operand.<no memory space> [shape: f32[1,1], index: 5, kind: input, shape index: {}]   ;;  %s918_s6 = inlined_call_operand.hbm [shape: f32[2,32], index: 6, kind: output, shape index: {}]  }
   0x1   :  { %v11_v0 = vstv %s917_s5 }
   0x2   :  { %12 = vst [vmem:[#allocation2] sm:$0x1] %v11_v0 }
   0x3   :  { %13 = vsyncpa [#allocation4], 0 }
   0x4   :  { %14 = vsyncpa [#allocation5], 0  ;;  %s730_s23 = smov [#allocation3]   ;;  %s682_s27 = scalar_lea.hbm %s914_s2, 1024 }
   0x5   :  { %s24_s24 = sshll.u32 %s730_s23, 4  ;;  %p683_p0 = scmp.ne.s32.totalorder %s914_s2, %s682_s27  ;;  %s25_s24 = int_to_ptr.vmem [resolvable:$true] %s24_s24 }
   0x6   :  { %p686_p1 = scmp.lt.u32.totalorder %s682_s27, %s914_s2 }
   0x8   :  { %p688_p2 = pnand %p686_p1, %p683_p0 }
   0xa   :  { %691 = shalt.err (!%p688_p2)
}
   0xb   :  { %s692_s5 = scalar_lea.vmem %s25_s24, 1024  ;;  %p697_p4 = scmp.lt.s32.totalorder %s25_s24, %s25_s24 }
   0xc   :  { %p693_p3 = scmp.ne.s32.totalorder %s25_s24, %s692_s5  ;;  %p698_p5 = scmp.lt.s32.totalorder %s692_s5, %s692_s5 }
   0xe   :  { %p699_p6 = por %p698_p5, %p697_p4 }
  0x10   :  { %p700_p7 = pnand %p699_p6, %p693_p3 }
  0x12   :  { %703 = shalt.err (!%p700_p7)
}
  0x13   :  { %s731_s8 = smov 256   ;;  %s732_s9 = smov 16  }
  0x14   :  { %30 = dma.hbm_to_vmem [thread:$0]  %s914_s2, 1024, %s25_s24, [#allocation4], %s731_s8, %s731_s8, %s732_s9  }
  0x15   :  { %726 = dma.done.wait [#allocation4], 1024  }
  0x16   :  { %727 = vsyncadd [#allocation4], 4294966272  ;;  %v733_v1 = vmov 0.0   ;;  %v49_v2 = vld [vmem:[#allocation3 + $0x8] sm:$0xff]  ;;  %v51_v3 = vld [vmem:[#allocation3 + $0x18] sm:$0xff]  ;;  %vm68_vm0 = vcmask 261120   ;;  %v58_v22 = vlaneseq }
  0x17   :  { %157 = vmatprep.mubr.f32.mxu0 %v733_v1  ;;  %181 = vmatprep.mubr.f32.mxu1 %v733_v1  ;;  %v48_v4 = vld [vmem:[#allocation3] sm:$0xff]  ;;  %v596_v5 = vpack.c.bf16 %v51_v3, %v49_v2  ;;  %v50_v6 = vld [vmem:[#allocation3 + $0x10] sm:$0xff]  ;;  %v53_v7 = vld [vmem:[#allocation3 + $0x28] sm:$0xff]  ;;  %vm425_vm1 = vcmask 7168   ;;  %vm554_vm2 = vcmask 1041409   ;;  %vm556_vm3 = vcmask 1042434  }
  0x18   :  { %v55_v8 = vld [vmem:[#allocation3 + $0x38] sm:$0xff]  ;;  %v598_v9 = vpack.c.bf16 %v50_v6, %v48_v4  ;;  %v52_v11 = vld [vmem:[#allocation3 + $0x20] sm:$0xff]  ;;  %v54_v12 = vld [vmem:[#allocation3 + $0x30] sm:$0xff]  ;;  %v59_v23 = vshrl.u32 %v58_v22, 7  ;;  %vm558_vm4 = vcmask 1043459   ;;  %vm560_vm5 = vcmask 1044484  }
  0x19   :  { %v600_v10 = vpack.c.bf16 %v55_v8, %v53_v7  ;;  %597 = vmatprep.subr.bf16.mxu0 %v596_v5  ;;  %604 = vmatprep.subr.bf16.mxu1 %v596_v5  ;;  %v602_v13 = vpack.c.bf16 %v54_v12, %v52_v11  ;;  %v791_v14 = vld [vmem:[%s912_s0] sm:$0xff]  ;;  %v805_v16 = vld [vmem:[%s912_s0 + $0x8] sm:$0xff]  ;;  %v819_v18 = vld [vmem:[%s912_s0 + $0x10] sm:$0xff]  ;;  %vm562_vm6 = vcmask 1045509   ;;  %vm564_vm7 = vcmask 1046534  }
  0x1a   :  { %599 = vmatpush1.bf16.msra.mxu0 %v598_v9  ;;  %606 = vmatpush1.bf16.msra.mxu1 %v598_v9  ;;  %v796_v15 = vld [vmem:[%s912_s0 + $0x20] sm:$0xff]  ;;  %v810_v17 = vld [vmem:[%s912_s0 + $0x28] sm:$0xff]  ;;  %v824_v19 = vld [vmem:[%s912_s0 + $0x30] sm:$0xff]  ;;  %v60_v24 = vsub.s32 0, %v59_v23  ;;  %v64_v26 = vsub.s32 1, %v59_v23  ;;  %vm566_vm8 = vcmask 1047559  }
  0x1b   :  { %601 = vmatprep.subr.bf16.mxu0 %v600_v10  ;;  %605 = vmatprep.subr.bf16.mxu1 %v600_v10  ;;  %v833_v20 = vld [vmem:[%s912_s0 + $0x18] sm:$0xff]  ;;  %v56_v25 = vld [vmem:[%s915_s3] sm:$0x3] }
  0x1c   :  { %v838_v21 = vld [vmem:[%s912_s0 + $0x38] sm:$0xff]  ;;  %v61_v27 = vrot.slane %v56_v25, %v60_v24  ;;  %v65_v28 = vrot.slane %v56_v25, %v64_v26  ;;  %v222_v45 = vld [vmem:[%s916_s4] sm:$0x3] }
  0x1d   :  { %v227_v54 = vrot.slane %v222_v45, %v60_v24  ;;  %v231_v55 = vrot.slane %v222_v45, %v64_v26 }
  0x1e   :  { %603 = vmatpush1.bf16.msra.mxu0 %v602_v13  ;;  %607 = vmatpush1.bf16.msra.mxu1 %v602_v13 }
  0x21   :  { %587 = vmatmul.mubr.msk.f32.vlgmr.msra.gmra.mrb[0].mxu0 %vm68_vm0, %v791_v14  ;;  %591 = vmatmul.mubr.msk.f32.vlgmr.msra.gmra.mrb[0].mxu1 %vm68_vm0, %v796_v15 }
  0x22   :  { %163 = vmatprep.mubr.f32.mxu0 %v733_v1  ;;  %187 = vmatprep.mubr.f32.mxu1 %v733_v1 }
  0x25   :  { %588 = vmatmul.mubr.msk.f32.gmra.mrb[2].mxu0 %vm68_vm0, %v805_v16  ;;  %592 = vmatmul.mubr.msk.f32.gmra.mrb[2].mxu1 %vm68_vm0, %v810_v17 }
  0x26   :  { %169 = vmatprep.mubr.f32.mxu0 %v733_v1  ;;  %193 = vmatprep.mubr.f32.mxu1 %v733_v1 }
  0x29   :  { %589 = vmatmul.mubr.msk.f32.gmra.mrb[4].mxu0 %vm68_vm0, %v819_v18  ;;  %593 = vmatmul.mubr.msk.f32.gmra.mrb[4].mxu1 %vm68_vm0, %v824_v19 }
  0x2a   :  { %175 = vmatprep.mubr.f32.mxu0 %v733_v1  ;;  %199 = vmatprep.mubr.f32.mxu1 %v733_v1 }
  0x2d   :  { %590 = vmatmul.mubr.msk.f32.gmra.mrb[6].mxu0 %vm68_vm0, %v833_v20  ;;  %594 = vmatmul.mubr.msk.f32.gmra.mrb[6].mxu1 %vm68_vm0, %v838_v21 }
  0xf4   :  { %v159_v29 = vpop.f32.mrb[0].mxu0  ;;  %v183_v30 = vpop.f32.mrb[0].mxu1 }
  0xf5   :  { %v160_v31 = vadd.f32 %v159_v29, %v61_v27  ;;  %v161_v32 = vpop.f32.mrb[1].mxu0  ;;  %v184_v33 = vadd.f32 %v183_v30, %v61_v27  ;;  %v185_v34 = vpop.f32.mrb[1].mxu1 }
  0xf6   :  { %v162_v35 = vadd.f32 %v161_v32, %v65_v28  ;;  %v186_v36 = vadd.f32 %v185_v34, %v65_v28 }
  0xf7   :  { %618 = vtanh.f32 %v160_v31 }
  0xf8   :  { %620 = vtanh.f32 %v162_v35  ;;  %v165_v37 = vpop.f32.mrb[2].mxu0  ;;  %v189_v38 = vpop.f32.mrb[2].mxu1 }
  0xf9   :  { %622 = vtanh.f32 %v184_v33  ;;  %v166_v39 = vadd.f32 %v165_v37, %v61_v27  ;;  %v190_v40 = vadd.f32 %v189_v38, %v61_v27  ;;  %v167_v41 = vpop.f32.mrb[3].mxu0  ;;  %v191_v42 = vpop.f32.mrb[3].mxu1 }
  0xfa   :  { %624 = vtanh.f32 %v186_v36  ;;  %v168_v43 = vadd.f32 %v167_v41, %v65_v28  ;;  %v192_v44 = vadd.f32 %v191_v42, %v65_v28 }
  0xfb   :  { %626 = vtanh.f32 %v166_v39 }
  0xfc   :  { %628 = vtanh.f32 %v190_v40  ;;  %v171_v46 = vpop.f32.mrb[4].mxu0  ;;  %v195_v47 = vpop.f32.mrb[4].mxu1 }
  0xfd   :  { %630 = vtanh.f32 %v168_v43  ;;  %v172_v48 = vadd.f32 %v171_v46, %v61_v27  ;;  %v173_v49 = vpop.f32.mrb[5].mxu0  ;;  %v196_v50 = vadd.f32 %v195_v47, %v61_v27  ;;  %v197_v51 = vpop.f32.mrb[5].mxu1 }
  0xfe   :  { %632 = vtanh.f32 %v192_v44  ;;  %v174_v52 = vadd.f32 %v173_v49, %v65_v28  ;;  %v198_v53 = vadd.f32 %v197_v51, %v65_v28  ;;  %v595_v49 = vld [vmem:[#allocation2] ss:$0 sm:$0xff] }
  0xff   :  { %634 = vtanh.f32 %v172_v48  ;;  %v734_v48 = vmov 0  }
 0x100   :  { %636 = vtanh.f32 %v174_v52  ;;  %v177_v56 = vpop.f32.mrb[6].mxu0  ;;  %v201_v57 = vpop.f32.mrb[6].mxu1  ;;  %616 = vset.pattern.permute.xlu0 %v734_v48  ;;  %617 = vset.pattern.permute.xlu1 %v734_v48 }
 0x101   :  { %v619_v58 = vpop.eup %618  ;;  %v178_v59 = vadd.f32 %v177_v56, %v61_v27  ;;  %638 = vtanh.f32 %v196_v50  ;;  %v179_v60 = vpop.f32.mrb[7].mxu0  ;;  %v202_v61 = vadd.f32 %v201_v57, %v61_v27 }
 0x102   :  { %v203_v62 = vpop.f32.mrb[7].mxu1  ;;  %v621_v63 = vpop.eup %620  ;;  %v180_v0 = vadd.f32 %v179_v60, %v65_v28  ;;  %640 = vtanh.f32 %v198_v53  ;;  %v234_v2 = vmul.f32 %v619_v58, %v227_v54 }
 0x103   :  { %v204_v1 = vadd.f32 %v203_v62, %v65_v28  ;;  %v623_v3 = vpop.eup %622  ;;  %642 = vtanh.f32 %v178_v59  ;;  %v235_v4 = vmul.f32 %v621_v63, %v231_v55 }
 0x104   :  { %v625_v5 = vpop.eup %624  ;;  %644 = vtanh.f32 %v180_v0  ;;  %v242_v6 = vmul.f32 %v623_v3, %v227_v54 }
 0x105   :  { %v627_v7 = vpop.eup %626  ;;  %646 = vtanh.f32 %v202_v61  ;;  %v250_v8 = vadd.f32 %v235_v4, %v234_v2  ;;  %v243_v9 = vmul.f32 %v625_v5, %v231_v55  ;;  %v305_v2 = vld [vmem:[%s913_s1] sm:$0xff] }
 0x106   :  { %v629_v10 = vpop.eup %628  ;;  %648 = vtanh.f32 %v204_v1  ;;  %v236_v11 = vmul.f32 %v627_v7, %v227_v54 }
 0x107   :  { %v631_v12 = vpop.eup %630  ;;  %251 = vadd.xlane.f32.xlu0 %v250_v8  ;;  %v244_v13 = vmul.f32 %v629_v10, %v227_v54  ;;  %v262_v22 = vadd.f32 %v243_v9, %v242_v6 }
 0x108   :  { %v633_v23 = vpop.eup %632  ;;  %v237_v24 = vmul.f32 %v631_v12, %v231_v55  ;;  %v306_v12 = vld [vmem:[%s913_s1 + $0x8] sm:$0xff] }
 0x109   :  { %v635_v25 = vpop.eup %634  ;;  %v245_v26 = vmul.f32 %v633_v23, %v231_v55  ;;  %v310_v23 = vld [vmem:[%s913_s1 + $0x28] sm:$0xff] }
 0x10a   :  { %v637_v27 = vpop.eup %636  ;;  %v253_v28 = vadd.f32 %v237_v24, %v236_v11  ;;  %v238_v29 = vmul.f32 %v635_v25, %v227_v54 }
 0x10b   :  { %v639_v30 = vpop.eup %638  ;;  %v265_v31 = vadd.f32 %v245_v26, %v244_v13  ;;  %v239_v32 = vmul.f32 %v637_v27, %v231_v55 }
 0x10c   :  { %v641_v33 = vpop.eup %640  ;;  %254 = vadd.xlane.f32.xlu0 %v253_v28  ;;  %v246_v34 = vmul.f32 %v639_v30, %v227_v54 }
 0x10d   :  { %v643_v35 = vpop.eup %642  ;;  %266 = vadd.xlane.f32.xlu1 %v265_v31  ;;  %v256_v36 = vadd.f32 %v239_v32, %v238_v29  ;;  %v247_v37 = vmul.f32 %v641_v33, %v231_v55  ;;  %v309_v29 = vld [vmem:[%s913_s1 + $0x20] sm:$0xff]  ;;  %v307_v33 = vld [vmem:[%s913_s1 + $0x10] sm:$0xff] }
 0x10e   :  { %v645_v38 = vpop.eup %644  ;;  %v240_v39 = vmul.f32 %v643_v35, %v227_v54 }
 0x10f   :  { %v647_v40 = vpop.eup %646  ;;  %v241_v41 = vmul.f32 %v645_v38, %v231_v55  ;;  %v268_v42 = vadd.f32 %v247_v37, %v246_v34 }
 0x110   :  { %v649_v43 = vpop.eup %648  ;;  %263 = vadd.xlane.f32.xlu0 %v262_v22  ;;  %v248_v44 = vmul.f32 %v647_v40, %v227_v54 }
 0x111   :  { %257 = vadd.xlane.f32.xlu1 %v256_v36  ;;  %v259_v45 = vadd.f32 %v241_v41, %v240_v39  ;;  %v249_v46 = vmul.f32 %v649_v43, %v231_v55 }
 0x113   :  { %v271_v47 = vadd.f32 %v249_v46, %v248_v44  ;;  %v308_v46 = vld [vmem:[%s913_s1 + $0x18] sm:$0xff] }
 0x114   :  { %269 = vadd.xlane.f32.xlu0 %v268_v42  ;;  %v311_v42 = vld [vmem:[%s913_s1 + $0x30] sm:$0xff] }
 0x115   :  { %260 = vadd.xlane.f32.xlu1 %v259_v45 }
 0x119   :  { %272 = vadd.xlane.f32.xlu1 %v271_v47 }
 0x194   :  { %v252_v50 = vpop.xlane.xlu0 %251 }
 0x195   :  { %v281_v51 = vadd.f32 %v595_v49, %v252_v50 }
 0x197   :  { %v289_v52 = vmul.f32 1.442695, %v281_v51 }
 0x199   :  { %650 = vpow2.f32 %v289_v52  ;;  %v255_v53 = vpop.xlane.xlu0 %254 }
 0x19a   :  { %v267_v56 = vpop.xlane.xlu1 %266  ;;  %v282_v57 = vadd.f32 %v595_v49, %v255_v53 }
 0x19b   :  { %v286_v58 = vadd.f32 %v595_v49, %v267_v56 }
 0x19c   :  { %v291_v54 = vmul.f32 1.442695, %v282_v57 }
 0x19d   :  { %v299_v59 = vmul.f32 1.442695, %v286_v58  ;;  %v264_v60 = vpop.xlane.xlu0 %263 }
 0x19e   :  { %652 = vpow2.f32 %v291_v54  ;;  %v258_v55 = vpop.xlane.xlu1 %257  ;;  %v285_v61 = vadd.f32 %v595_v49, %v264_v60 }
 0x19f   :  { %654 = vpow2.f32 %v299_v59  ;;  %v283_v62 = vadd.f32 %v595_v49, %v258_v55 }
 0x1a0   :  { %v297_v63 = vmul.f32 1.442695, %v285_v61 }
 0x1a1   :  { %v293_v0 = vmul.f32 1.442695, %v283_v62  ;;  %v270_v1 = vpop.xlane.xlu0 %269  ;;  %v312_v62 = vld [vmem:[%s913_s1 + $0x38] sm:$0xff] }
 0x1a2   :  { %656 = vpow2.f32 %v297_v63  ;;  %v261_v3 = vpop.xlane.xlu1 %260  ;;  %v287_v4 = vadd.f32 %v595_v49, %v270_v1 }
 0x1a3   :  { %v651_v5 = vpop.eup %650  ;;  %658 = vpow2.f32 %v293_v0  ;;  %v284_v6 = vadd.f32 %v595_v49, %v261_v3 }
 0x1a4   :  { %v301_v7 = vmul.f32 1.442695, %v287_v4  ;;  %v313_v8 = vmul.f32 %v651_v5, %v305_v2 }
 0x1a5   :  { %v295_v9 = vmul.f32 1.442695, %v284_v6 }
 0x1a6   :  { %660 = vpow2.f32 %v301_v7  ;;  %v273_v10 = vpop.xlane.xlu1 %272  ;;  %323 = vperm.xlu0 %616, %v313_v8   ;;  %v426_v11 = vsel %vm425_vm1, %v313_v8, 0.0 }
 0x1a7   :  { %662 = vpow2.f32 %v295_v9  ;;  %v288_v13 = vadd.f32 %v595_v49, %v273_v10  ;;  %v427_v22 = vrot.slane %v426_v11, 4 }
 0x1a8   :  { %v653_v24 = vpop.eup %652 }
 0x1a9   :  { %v655_v25 = vpop.eup %654  ;;  %v303_v26 = vmul.f32 1.442695, %v288_v13  ;;  %v428_v27 = vadd.f32 %v427_v22, %v426_v11  ;;  %v314_v28 = vmul.f32 %v653_v24, %v306_v12 }
 0x1aa   :  { %v318_v30 = vmul.f32 %v655_v25, %v310_v23 }
 0x1ab   :  { %664 = vpow2.f32 %v303_v26  ;;  %v429_v31 = vrot.slane %v428_v27, 2  ;;  %v433_v32 = vsel %vm425_vm1, %v314_v28, 0.0 }
 0x1ac   :  { %v657_v34 = vpop.eup %656  ;;  %v434_v35 = vrot.slane %v433_v32, 4  ;;  %v461_v36 = vsel %vm425_vm1, %v318_v30, 0.0 }
 0x1ad   :  { %v659_v37 = vpop.eup %658  ;;  %v317_v38 = vmul.f32 %v657_v34, %v309_v29  ;;  %v462_v39 = vrot.slane %v461_v36, 4  ;;  %v430_v43 = vadd.f32 %v429_v31, %v428_v27 }
 0x1ae   :  { %v435_v40 = vadd.f32 %v434_v35, %v433_v32  ;;  %v315_v41 = vmul.f32 %v659_v37, %v307_v33 }
 0x1af   :  { %343 = vperm.xlu1 %617, %v317_v38   ;;  %v454_v44 = vsel %vm425_vm1, %v317_v38, 0.0  ;;  %v463_v45 = vadd.f32 %v462_v39, %v461_v36  ;;  %v431_v59 = vrot.slane %v430_v43, 1 }
 0x1b0   :  { %v661_v47 = vpop.eup %660  ;;  %v455_v48 = vrot.slane %v454_v44, 4  ;;  %v436_v49 = vrot.slane %v435_v40, 2  ;;  %v440_v50 = vsel %vm425_vm1, %v315_v41, 0.0 }
 0x1b1   :  { %v663_v51 = vpop.eup %662  ;;  %v464_v52 = vrot.slane %v463_v45, 2  ;;  %v441_v53 = vrot.slane %v440_v50, 4  ;;  %v319_v56 = vmul.f32 %v661_v47, %v311_v42  ;;  %v432_v11 = vadd.f32 %v431_v59, %v430_v43 }
 0x1b2   :  { %v456_v57 = vadd.f32 %v455_v48, %v454_v44  ;;  %v437_v58 = vadd.f32 %v436_v49, %v435_v40  ;;  %v316_v54 = vmul.f32 %v663_v51, %v308_v46 }
 0x1b3   :  { %328 = vperm.xlu1 %617, %v314_v28   ;;  %v465_v60 = vadd.f32 %v464_v52, %v463_v45  ;;  %v442_v55 = vadd.f32 %v441_v53, %v440_v50  ;;  %v468_v61 = vsel %vm425_vm1, %v319_v56, 0.0  ;;  %v482_v33 = vadd.f32 1e-08, %v432_v11 }
 0x1b4   :  { %v457_v63 = vrot.slane %v456_v57, 2  ;;  %v438_v0 = vrot.slane %v437_v58, 1  ;;  %v469_v1 = vrot.slane %v468_v61, 4  ;;  %v447_v2 = vsel %vm425_vm1, %v316_v54, 0.0 }
 0x1b5   :  { %v665_v3 = vpop.eup %664  ;;  %v466_v4 = vrot.slane %v465_v60, 1  ;;  %v443_v5 = vrot.slane %v442_v55, 2  ;;  %v448_v6 = vrot.slane %v447_v2, 4 }
 0x1b6   :  { %v458_v7 = vadd.f32 %v457_v63, %v456_v57  ;;  %v439_v8 = vadd.f32 %v438_v0, %v437_v58  ;;  %v470_v9 = vadd.f32 %v469_v1, %v468_v61  ;;  %v320_v10 = vmul.f32 %v665_v3, %v312_v62 }
 0x1b7   :  { %v467_v12 = vadd.f32 %v466_v4, %v465_v60  ;;  %348 = vperm.xlu1 %617, %v318_v30   ;;  %v444_v13 = vadd.f32 %v443_v5, %v442_v55  ;;  %v449_v22 = vadd.f32 %v448_v6, %v447_v2 }
 0x1b8   :  { %v459_v23 = vrot.slane %v458_v7, 1  ;;  %v483_v24 = vadd.f32 1e-08, %v439_v8  ;;  %v471_v25 = vrot.slane %v470_v9, 2  ;;  %v475_v26 = vsel %vm425_vm1, %v320_v10, 0.0 }
 0x1b9   :  { %v450_v27 = vrot.slane %v449_v22, 2  ;;  %v476_v28 = vrot.slane %v475_v26, 4  ;;  %v487_v29 = vadd.f32 1e-08, %v467_v12  ;;  %v445_v35 = vrot.slane %v444_v13, 1 }
 0x1ba   :  { %666 = vrcp.f32 %v483_v24  ;;  %v460_v34 = vadd.f32 %v459_v23, %v458_v7  ;;  %v472_v36 = vadd.f32 %v471_v25, %v470_v9 }
 0x1bb   :  { %333 = vperm.xlu1 %617, %v315_v41   ;;  %v451_v31 = vadd.f32 %v450_v27, %v449_v22  ;;  %v477_v32 = vadd.f32 %v476_v28, %v475_v26  ;;  %668 = vrcp.f32 %v487_v29  ;;  %v446_v42 = vadd.f32 %v445_v35, %v444_v13 }
 0x1bc   :  { %670 = vrcp.f32 %v482_v33  ;;  %v486_v40 = vadd.f32 1e-08, %v460_v34  ;;  %v473_v43 = vrot.slane %v472_v36, 1 }
 0x1bd   :  { %v452_v37 = vrot.slane %v451_v31, 1  ;;  %v478_v30 = vrot.slane %v477_v32, 2  ;;  %v484_v47 = vadd.f32 1e-08, %v446_v42 }
 0x1be   :  { %v474_v48 = vadd.f32 %v473_v43, %v472_v36 }
 0x1bf   :  { %353 = vperm.xlu1 %617, %v319_v56   ;;  %v453_v38 = vadd.f32 %v452_v37, %v451_v31  ;;  %v479_v39 = vadd.f32 %v478_v30, %v477_v32 }
 0x1c0   :  { %v488_v51 = vadd.f32 1e-08, %v474_v48 }
 0x1c1   :  { %v485_v44 = vadd.f32 1e-08, %v453_v38  ;;  %v480_v45 = vrot.slane %v479_v39, 1 }
 0x1c3   :  { %672 = vrcp.f32 %v485_v44  ;;  %338 = vperm.xlu1 %617, %v316_v54   ;;  %v481_v41 = vadd.f32 %v480_v45, %v479_v39 }
 0x1c4   :  { %v667_v46 = vpop.eup %666  ;;  %674 = vrcp.f32 %v486_v40 }
 0x1c5   :  { %505 = vperm.xlu0 %616, %v667_v46   ;;  %v489_v49 = vadd.f32 1e-08, %v481_v41  ;;  %v669_v50 = vpop.eup %668 }
 0x1c6   :  { %v671_v52 = vpop.eup %670 }
 0x1c7   :  { %676 = vrcp.f32 %v489_v49  ;;  %358 = vperm.xlu1 %617, %v320_v10  }
 0x1c8   :  { %678 = vrcp.f32 %v484_v47 }
 0x1c9   :  { %525 = vperm.xlu0 %616, %v669_v50   ;;  %680 = vrcp.f32 %v488_v51 }
 0x1cb   :  { %500 = vperm.xlu1 %617, %v671_v52  }
 0x1cd   :  { %v673_v53 = vpop.eup %672 }
 0x1ce   :  { %v675_v56 = vpop.eup %674  ;;  %515 = vperm.xlu0 %616, %v673_v53  }
 0x1cf   :  { %520 = vperm.xlu1 %617, %v675_v56  }
 0x1d1   :  { %v677_v57 = vpop.eup %676 }
 0x1d2   :  { %v679_v58 = vpop.eup %678  ;;  %535 = vperm.xlu0 %616, %v677_v57  }
 0x1d3   :  { %510 = vperm.xlu1 %617, %v679_v58   ;;  %v681_v54 = vpop.eup %680 }
 0x1d7   :  { %530 = vperm.xlu1 %617, %v681_v54  }
 0x225   :  { %v324_v60 = vpop.permute.xlu0 %323 }
 0x226   :  { %v361_v61 = vmul.f32 %v324_v60, %v791_v14 }
 0x228   :  { %v369_v0 = vsel %vm68_vm0, %v361_v61, 0.0 }
 0x229   :  { %v370_v4 = vrot.slane %v369_v0, 4 }
 0x22b   :  { %v371_v9 = vadd.f32 %v370_v4, %v369_v0 }
 0x22d   :  { %v372_v24 = vrot.slane %v371_v9, 2 }
 0x22e   :  { %v344_v59 = vpop.permute.xlu1 %343 }
 0x22f   :  { %v365_v1 = vmul.f32 %v344_v59, %v796_v15 }
 0x231   :  { %v397_v8 = vsel %vm68_vm0, %v365_v1, 0.0 }
 0x232   :  { %v329_v55 = vpop.permute.xlu1 %328  ;;  %v398_v12 = vrot.slane %v397_v8, 4 }
 0x233   :  { %v362_v62 = vmul.f32 %v329_v55, %v805_v16 }
 0x234   :  { %v399_v26 = vadd.f32 %v398_v12, %v397_v8 }
 0x235   :  { %v376_v2 = vsel %vm68_vm0, %v362_v62, 0.0 }
 0x236   :  { %v349_v63 = vpop.permute.xlu1 %348  ;;  %v377_v6 = vrot.slane %v376_v2, 4  ;;  %v400_v37 = vrot.slane %v399_v26, 2 }
 0x237   :  { %v366_v3 = vmul.f32 %v349_v63, %v810_v17 }
 0x238   :  { %v378_v15 = vadd.f32 %v377_v6, %v376_v2  ;;  %v401_v49 = vadd.f32 %v400_v37, %v399_v26 }
 0x239   :  { %v404_v14 = vsel %vm68_vm0, %v366_v3, 0.0 }
 0x23a   :  { %v334_v5 = vpop.permute.xlu1 %333  ;;  %v405_v22 = vrot.slane %v404_v14, 4  ;;  %v379_v27 = vrot.slane %v378_v15, 2  ;;  %v402_v60 = vrot.slane %v401_v49, 1 }
 0x23b   :  { %v363_v7 = vmul.f32 %v334_v5, %v819_v18 }
 0x23c   :  { %v406_v29 = vadd.f32 %v405_v22, %v404_v14  ;;  %v380_v30 = vadd.f32 %v379_v27, %v378_v15  ;;  %v403_v6 = vadd.f32 %v402_v60, %v401_v49 }
 0x23d   :  { %v383_v16 = vsel %vm68_vm0, %v363_v7, 0.0 }
 0x23e   :  { %v384_v10 = vrot.slane %v383_v16, 4  ;;  %v354_v11 = vpop.permute.xlu1 %353  ;;  %v407_v39 = vrot.slane %v406_v29, 2  ;;  %v381_v47 = vrot.slane %v380_v30, 1 }
 0x23f   :  { %v367_v13 = vmul.f32 %v354_v11, %v824_v19  ;;  %v373_v19 = vadd.f32 %v372_v24, %v371_v9 }
 0x240   :  { %v385_v17 = vadd.f32 %v384_v10, %v383_v16  ;;  %v408_v51 = vadd.f32 %v407_v39, %v406_v29  ;;  %v382_v59 = vadd.f32 %v381_v47, %v380_v30 }
 0x241   :  { %v411_v23 = vsel %vm68_vm0, %v367_v13, 0.0  ;;  %v374_v46 = vrot.slane %v373_v19, 1 }
 0x242   :  { %v412_v25 = vrot.slane %v411_v23, 4  ;;  %v339_v18 = vpop.permute.xlu1 %338  ;;  %v386_v31 = vrot.slane %v385_v17, 2  ;;  %v409_v55 = vrot.slane %v408_v51, 1 }
 0x243   :  { %v364_v28 = vmul.f32 %v339_v18, %v833_v20 }
 0x244   :  { %v413_v32 = vadd.f32 %v412_v25, %v411_v23  ;;  %v506_v34 = vpop.permute.xlu0 %505  ;;  %v387_v44 = vadd.f32 %v386_v31, %v385_v17  ;;  %v410_v8 = vadd.f32 %v409_v55, %v408_v51 }
 0x245   :  { %v390_v33 = vsel %vm68_vm0, %v364_v28, 0.0  ;;  %v539_v3 = vmul.f32 %v506_v34, %v382_v59 }
 0x246   :  { %v391_v35 = vrot.slane %v390_v33, 4  ;;  %v359_v36 = vpop.permute.xlu1 %358  ;;  %v414_v42 = vrot.slane %v413_v32, 2  ;;  %v388_v53 = vrot.slane %v387_v44, 1 }
 0x247   :  { %v368_v38 = vmul.f32 %v359_v36, %v838_v21  ;;  %v375_v21 = vadd.f32 %v374_v46, %v373_v19 }
 0x248   :  { %v392_v40 = vadd.f32 %v391_v35, %v390_v33  ;;  %v526_v48 = vpop.permute.xlu0 %525  ;;  %v415_v56 = vadd.f32 %v414_v42, %v413_v32  ;;  %v389_v1 = vadd.f32 %v388_v53, %v387_v44 }
 0x249   :  { %v418_v43 = vsel %vm68_vm0, %v368_v38, 0.0  ;;  %v543_v15 = vmul.f32 %v526_v48, %v410_v8 }
 0x24a   :  { %v393_v20 = vrot.slane %v392_v40, 2  ;;  %v419_v45 = vrot.slane %v418_v43, 4  ;;  %v501_v41 = vpop.permute.xlu1 %500  ;;  %v416_v2 = vrot.slane %v415_v56, 1 }
 0x24b   :  { %v538_v61 = vmul.f32 %v501_v41, %v375_v21 }
 0x24c   :  { %v420_v50 = vadd.f32 %v419_v45, %v418_v43  ;;  %v394_v52 = vadd.f32 %v393_v20, %v392_v40  ;;  %v417_v12 = vadd.f32 %v416_v2, %v415_v56 }
 0x24d   :  { %v516_v0 = vpop.permute.xlu0 %515  ;;  %v555_v14 = vsel %vm554_vm2, %v539_v3, %v538_v61 }
 0x24e   :  { %v421_v57 = vrot.slane %v420_v50, 2  ;;  %v395_v58 = vrot.slane %v394_v52, 1  ;;  %v521_v54 = vpop.permute.xlu1 %520 }
 0x24f   :  { %v542_v10 = vmul.f32 %v521_v54, %v403_v6 }
 0x250   :  { %v396_v62 = vadd.f32 %v395_v58, %v394_v52  ;;  %v422_v63 = vadd.f32 %v421_v57, %v420_v50 }
 0x251   :  { %v536_v17 = vpop.permute.xlu0 %535 }
 0x252   :  { %v423_v4 = vrot.slane %v422_v63, 1  ;;  %v511_v5 = vpop.permute.xlu1 %510  ;;  %v541_v16 = vmul.f32 %v516_v0, %v396_v62 }
 0x253   :  { %v540_v7 = vmul.f32 %v511_v5, %v389_v1 }
 0x254   :  { %v424_v9 = vadd.f32 %v423_v4, %v422_v63 }
 0x255   :  { %v557_v11 = vsel %vm556_vm3, %v540_v7, %v555_v14 }
 0x256   :  { %v559_v13 = vsel %vm558_vm4, %v541_v16, %v557_v11  ;;  %v531_v22 = vpop.permute.xlu1 %530  ;;  %v545_v25 = vmul.f32 %v536_v17, %v424_v9 }
 0x257   :  { %v544_v23 = vmul.f32 %v531_v22, %v417_v12  ;;  %v561_v24 = vsel %vm560_vm5, %v542_v10, %v559_v13 }
 0x258   :  { %v563_v18 = vsel %vm562_vm6, %v543_v15, %v561_v24 }
 0x259   :  { %v565_v26 = vsel %vm564_vm7, %v544_v23, %v563_v18 }
 0x25a   :  { %v567_v27 = vsel %vm566_vm8, %v545_v25, %v565_v26 }
 0x25b   :  { %569 = vst.msk [vmem:[#allocation6] sm:$0xff] %vm68_vm0, %v567_v27 }
 0x25c   :  { %574 = vsyncadd [#allocation5], 96  ;;  %s735_s1 = smov [#allocation6]  }
 0x25d   :  { %s575_s18 = sshll.u32 %s735_s1, 4  ;;  %s576_s18 = int_to_ptr.vmem [resolvable:$true] %s575_s18 }
 0x25e   :  { %s704_s19 = scalar_lea.vmem %s576_s18, 32  ;;  %s708_s20 = scalar_lea.vmem %s576_s18, 128 }
 0x25f   :  { %p705_p8 = scmp.ne.s32.totalorder %s576_s18, %s704_s19  ;;  %p709_p9 = scmp.lt.s32.totalorder %s576_s18, %s576_s18 }
 0x260   :  { %p710_p10 = scmp.lt.s32.totalorder %s708_s20, %s704_s19 }
 0x262   :  { %p711_p11 = por %p710_p10, %p709_p9 }
 0x264   :  { %p712_p12 = pnand %p711_p11, %p705_p8 }
 0x266   :  { %715 = shalt.err (!%p712_p12)
}
 0x267   :  { %s716_s23 = scalar_lea.hbm %s918_s6, 32 }
 0x268   :  { %p717_p13 = scmp.ne.s32.totalorder %s918_s6, %s716_s23  ;;  %p720_p0 = scmp.lt.u32.totalorder %s716_s23, %s918_s6 }
 0x26a   :  { %p722_p1 = pnand %p720_p0, %p717_p13 }
 0x26c   :  { %725 = shalt.err (!%p722_p1)
}
 0x26d   :  { %s736_s28 = smov 32   ;;  %s737_s0 = smov 2  }
 0x26e   :  { %581 = dma.vmem_to_hbm [thread:$0]  %s576_s18, 32, %s918_s6, [#allocation5], %s736_s28, %s736_s28, %s737_s0  }
 0x26f   :  { %728 = dma.done.wait [#allocation5], 128  }
 0x270   :  { %729 = vsyncadd [#allocation5], 4294967168 }
 0x271   :  { %585 = vsyncpa [#allocation4], 1 }
 0x272   :  { %586 = vsyncpa [#allocation5], 1 }

// kernel: tpu_custom_call.1
= control target key start
LH: loop header
LB: loop body
LE: loop exit
PB: predicated region body
PF: predicated region fallthrough
CT: control target
= control target key end

     0   :  { %s912_s0 = inlined_call_operand.vmem [shape: f32[16,32], index: 0, kind: input, shape index: {}]   ;;  %s913_s1 = inlined_call_operand.vmem [shape: f32[16,1], index: 1, kind: input, shape index: {}]   ;;  %s914_s2 = inlined_call_operand.hbm [shape: f32[32,256], index: 2, kind: input, shape index: {}]   ;;  %s915_s3 = inlined_call_operand.vmem [shape: f32[1,256], index: 3, kind: input, shape index: {}]   ;;  %s916_s4 = inlined_call_operand.vmem [shape: f32[1,256], index: 4, kind: input, shape index: {}]   ;;  %s917_s5 = inlined_call_operand.<no memory space> [shape: f32[1,1], index: 5, kind: input, shape index: {}]   ;;  %s918_s6 = inlined_call_operand.hbm [shape: f32[2,32], index: 6, kind: output, shape index: {}]  }
   0x1   :  { %v11_v0 = vstv %s917_s5 }
   0x2   :  { %12 = vst [vmem:[#allocation2] sm:$0x1] %v11_v0 }
   0x3   :  { %13 = vsyncpa [#allocation4], 0 }
   0x4   :  { %14 = vsyncpa [#allocation5], 0  ;;  %s730_s23 = smov [#allocation3]   ;;  %s682_s27 = scalar_lea.hbm %s914_s2, 1024 }
   0x5   :  { %s24_s24 = sshll.u32 %s730_s23, 4  ;;  %p683_p0 = scmp.ne.s32.totalorder %s914_s2, %s682_s27  ;;  %s25_s24 = int_to_ptr.vmem [resolvable:$true] %s24_s24 }
   0x6   :  { %p686_p1 = scmp.lt.u32.totalorder %s682_s27, %s914_s2 }
   0x8   :  { %p688_p2 = pnand %p686_p1, %p683_p0 }
   0xa   :  { %691 = shalt.err (!%p688_p2)
}
   0xb   :  { %s692_s5 = scalar_lea.vmem %s25_s24, 1024  ;;  %p697_p4 = scmp.lt.s32.totalorder %s25_s24, %s25_s24 }
   0xc   :  { %p693_p3 = scmp.ne.s32.totalorder %s25_s24, %s692_s5  ;;  %p698_p5 = scmp.lt.s32.totalorder %s692_s5, %s692_s5 }
   0xe   :  { %p699_p6 = por %p698_p5, %p697_p4 }
  0x10   :  { %p700_p7 = pnand %p699_p6, %p693_p3 }
  0x12   :  { %703 = shalt.err (!%p700_p7)
}
  0x13   :  { %s731_s8 = smov 256   ;;  %s732_s9 = smov 16  }
  0x14   :  { %30 = dma.hbm_to_vmem [thread:$0]  %s914_s2, 1024, %s25_s24, [#allocation4], %s731_s8, %s731_s8, %s732_s9  }
  0x15   :  { %726 = dma.done.wait [#allocation4], 1024  }
  0x16   :  { %727 = vsyncadd [#allocation4], 4294966272  ;;  %v733_v1 = vmov 0.0   ;;  %v49_v2 = vld [vmem:[#allocation3 + $0x8] sm:$0xff]  ;;  %v51_v3 = vld [vmem:[#allocation3 + $0x18] sm:$0xff]  ;;  %vm68_vm0 = vcmask 261120   ;;  %v58_v22 = vlaneseq }
  0x17   :  { %157 = vmatprep.mubr.f32.mxu0 %v733_v1  ;;  %181 = vmatprep.mubr.f32.mxu1 %v733_v1  ;;  %v48_v4 = vld [vmem:[#allocation3] sm:$0xff]  ;;  %v596_v5 = vpack.c.bf16 %v51_v3, %v49_v2  ;;  %v50_v6 = vld [vmem:[#allocation3 + $0x10] sm:$0xff]  ;;  %v53_v7 = vld [vmem:[#allocation3 + $0x28] sm:$0xff]  ;;  %vm425_vm1 = vcmask 7168   ;;  %vm554_vm2 = vcmask 1041409   ;;  %vm556_vm3 = vcmask 1042434  }
  0x18   :  { %v55_v8 = vld [vmem:[#allocation3 + $0x38] sm:$0xff]  ;;  %v598_v9 = vpack.c.bf16 %v50_v6, %v48_v4  ;;  %v52_v11 = vld [vmem:[#allocation3 + $0x20] sm:$0xff]  ;;  %v54_v12 = vld [vmem:[#allocation3 + $0x30] sm:$0xff]  ;;  %v59_v23 = vshrl.u32 %v58_v22, 7  ;;  %vm558_vm4 = vcmask 1043459   ;;  %vm560_vm5 = vcmask 1044484  }
  0x19   :  { %v600_v10 = vpack.c.bf16 %v55_v8, %v53_v7  ;;  %597 = vmatprep.subr.bf16.mxu0 %v596_v5  ;;  %604 = vmatprep.subr.bf16.mxu1 %v596_v5  ;;  %v602_v13 = vpack.c.bf16 %v54_v12, %v52_v11  ;;  %v791_v14 = vld [vmem:[%s912_s0] sm:$0xff]  ;;  %v805_v16 = vld [vmem:[%s912_s0 + $0x8] sm:$0xff]  ;;  %v819_v18 = vld [vmem:[%s912_s0 + $0x10] sm:$0xff]  ;;  %vm562_vm6 = vcmask 1045509   ;;  %vm564_vm7 = vcmask 1046534  }
  0x1a   :  { %599 = vmatpush1.bf16.msra.mxu0 %v598_v9  ;;  %606 = vmatpush1.bf16.msra.mxu1 %v598_v9  ;;  %v796_v15 = vld [vmem:[%s912_s0 + $0x20] sm:$0xff]  ;;  %v810_v17 = vld [vmem:[%s912_s0 + $0x28] sm:$0xff]  ;;  %v824_v19 = vld [vmem:[%s912_s0 + $0x30] sm:$0xff]  ;;  %v60_v24 = vsub.s32 0, %v59_v23  ;;  %v64_v26 = vsub.s32 1, %v59_v23  ;;  %vm566_vm8 = vcmask 1047559  }
  0x1b   :  { %601 = vmatprep.subr.bf16.mxu0 %v600_v10  ;;  %605 = vmatprep.subr.bf16.mxu1 %v600_v10  ;;  %v833_v20 = vld [vmem:[%s912_s0 + $0x18] sm:$0xff]  ;;  %v56_v25 = vld [vmem:[%s915_s3] sm:$0x3] }
  0x1c   :  { %v838_v21 = vld [vmem:[%s912_s0 + $0x38] sm:$0xff]  ;;  %v61_v27 = vrot.slane %v56_v25, %v60_v24  ;;  %v65_v28 = vrot.slane %v56_v25, %v64_v26  ;;  %v222_v45 = vld [vmem:[%s916_s4] sm:$0x3] }
  0x1d   :  { %v227_v54 = vrot.slane %v222_v45, %v60_v24  ;;  %v231_v55 = vrot.slane %v222_v45, %v64_v26 }
  0x1e   :  { %603 = vmatpush1.bf16.msra.mxu0 %v602_v13  ;;  %607 = vmatpush1.bf16.msra.mxu1 %v602_v13 }
  0x21   :  { %587 = vmatmul.mubr.msk.f32.vlgmr.msra.gmra.mrb[0].mxu0 %vm68_vm0, %v791_v14  ;;  %591 = vmatmul.mubr.msk.f32.vlgmr.msra.gmra.mrb[0].mxu1 %vm68_vm0, %v796_v15 }
  0x22   :  { %163 = vmatprep.mubr.f32.mxu0 %v733_v1  ;;  %187 = vmatprep.mubr.f32.mxu1 %v733_v1 }
  0x25   :  { %588 = vmatmul.mubr.msk.f32.gmra.mrb[2].mxu0 %vm68_vm0, %v805_v16  ;;  %592 = vmatmul.mubr.msk.f32.gmra.mrb[2].mxu1 %vm68_vm0, %v810_v17 }
  0x26   :  { %169 = vmatprep.mubr.f32.mxu0 %v733_v1  ;;  %193 = vmatprep.mubr.f32.mxu1 %v733_v1 }
  0x29   :  { %589 = vmatmul.mubr.msk.f32.gmra.mrb[4].mxu0 %vm68_vm0, %v819_v18  ;;  %593 = vmatmul.mubr.msk.f32.gmra.mrb[4].mxu1 %vm68_vm0, %v824_v19 }
  0x2a   :  { %175 = vmatprep.mubr.f32.mxu0 %v733_v1  ;;  %199 = vmatprep.mubr.f32.mxu1 %v733_v1 }
  0x2d   :  { %590 = vmatmul.mubr.msk.f32.gmra.mrb[6].mxu0 %vm68_vm0, %v833_v20  ;;  %594 = vmatmul.mubr.msk.f32.gmra.mrb[6].mxu1 %vm68_vm0, %v838_v21 }
  0xf4   :  { %v159_v29 = vpop.f32.mrb[0].mxu0  ;;  %v183_v30 = vpop.f32.mrb[0].mxu1 }
  0xf5   :  { %v160_v31 = vadd.f32 %v159_v29, %v61_v27  ;;  %v161_v32 = vpop.f32.mrb[1].mxu0  ;;  %v184_v33 = vadd.f32 %v183_v30, %v61_v27  ;;  %v185_v34 = vpop.f32.mrb[1].mxu1 }
  0xf6   :  { %v162_v35 = vadd.f32 %v161_v32, %v65_v28  ;;  %v186_v36 = vadd.f32 %v185_v34, %v65_v28 }
  0xf7   :  { %618 = vtanh.f32 %v160_v31 }
  0xf8   :  { %620 = vtanh.f32 %v162_v35  ;;  %v165_v37 = vpop.f32.mrb[2].mxu0  ;;  %v189_v38 = vpop.f32.mrb[2].mxu1 }
  0xf9   :  { %622 = vtanh.f32 %v184_v33  ;;  %v166_v39 = vadd.f32 %v165_v37, %v61_v27  ;;  %v190_v40 = vadd.f32 %v189_v38, %v61_v27  ;;  %v167_v41 = vpop.f32.mrb[3].mxu0  ;;  %v191_v42 = vpop.f32.mrb[3].mxu1 }
  0xfa   :  { %624 = vtanh.f32 %v186_v36  ;;  %v168_v43 = vadd.f32 %v167_v41, %v65_v28  ;;  %v192_v44 = vadd.f32 %v191_v42, %v65_v28 }
  0xfb   :  { %626 = vtanh.f32 %v166_v39 }
  0xfc   :  { %628 = vtanh.f32 %v190_v40  ;;  %v171_v46 = vpop.f32.mrb[4].mxu0  ;;  %v195_v47 = vpop.f32.mrb[4].mxu1 }
  0xfd   :  { %630 = vtanh.f32 %v168_v43  ;;  %v172_v48 = vadd.f32 %v171_v46, %v61_v27  ;;  %v173_v49 = vpop.f32.mrb[5].mxu0  ;;  %v196_v50 = vadd.f32 %v195_v47, %v61_v27  ;;  %v197_v51 = vpop.f32.mrb[5].mxu1 }
  0xfe   :  { %632 = vtanh.f32 %v192_v44  ;;  %v174_v52 = vadd.f32 %v173_v49, %v65_v28  ;;  %v198_v53 = vadd.f32 %v197_v51, %v65_v28  ;;  %v595_v49 = vld [vmem:[#allocation2] ss:$0 sm:$0xff] }
  0xff   :  { %634 = vtanh.f32 %v172_v48  ;;  %v734_v48 = vmov 0  }
 0x100   :  { %636 = vtanh.f32 %v174_v52  ;;  %v177_v56 = vpop.f32.mrb[6].mxu0  ;;  %v201_v57 = vpop.f32.mrb[6].mxu1  ;;  %616 = vset.pattern.permute.xlu0 %v734_v48  ;;  %617 = vset.pattern.permute.xlu1 %v734_v48 }
 0x101   :  { %v619_v58 = vpop.eup %618  ;;  %v178_v59 = vadd.f32 %v177_v56, %v61_v27  ;;  %638 = vtanh.f32 %v196_v50  ;;  %v179_v60 = vpop.f32.mrb[7].mxu0  ;;  %v202_v61 = vadd.f32 %v201_v57, %v61_v27 }
 0x102   :  { %v203_v62 = vpop.f32.mrb[7].mxu1  ;;  %v621_v63 = vpop.eup %620  ;;  %v180_v0 = vadd.f32 %v179_v60, %v65_v28  ;;  %640 = vtanh.f32 %v198_v53  ;;  %v234_v2 = vmul.f32 %v619_v58, %v227_v54 }
 0x103   :  { %v204_v1 = vadd.f32 %v203_v62, %v65_v28  ;;  %v623_v3 = vpop.eup %622  ;;  %642 = vtanh.f32 %v178_v59  ;;  %v235_v4 = vmul.f32 %v621_v63, %v231_v55 }
 0x104   :  { %v625_v5 = vpop.eup %624  ;;  %644 = vtanh.f32 %v180_v0  ;;  %v242_v6 = vmul.f32 %v623_v3, %v227_v54 }
 0x105   :  { %v627_v7 = vpop.eup %626  ;;  %646 = vtanh.f32 %v202_v61  ;;  %v250_v8 = vadd.f32 %v235_v4, %v234_v2  ;;  %v243_v9 = vmul.f32 %v625_v5, %v231_v55  ;;  %v305_v2 = vld [vmem:[%s913_s1] sm:$0xff] }
 0x106   :  { %v629_v10 = vpop.eup %628  ;;  %648 = vtanh.f32 %v204_v1  ;;  %v236_v11 = vmul.f32 %v627_v7, %v227_v54 }
 0x107   :  { %v631_v12 = vpop.eup %630  ;;  %251 = vadd.xlane.f32.xlu0 %v250_v8  ;;  %v244_v13 = vmul.f32 %v629_v10, %v227_v54  ;;  %v262_v22 = vadd.f32 %v243_v9, %v242_v6 }
 0x108   :  { %v633_v23 = vpop.eup %632  ;;  %v237_v24 = vmul.f32 %v631_v12, %v231_v55  ;;  %v306_v12 = vld [vmem:[%s913_s1 + $0x8] sm:$0xff] }
 0x109   :  { %v635_v25 = vpop.eup %634  ;;  %v245_v26 = vmul.f32 %v633_v23, %v231_v55  ;;  %v310_v23 = vld [vmem:[%s913_s1 + $0x28] sm:$0xff] }
 0x10a   :  { %v637_v27 = vpop.eup %636  ;;  %v253_v28 = vadd.f32 %v237_v24, %v236_v11  ;;  %v238_v29 = vmul.f32 %v635_v25, %v227_v54 }
 0x10b   :  { %v639_v30 = vpop.eup %638  ;;  %v265_v31 = vadd.f32 %v245_v26, %v244_v13  ;;  %v239_v32 = vmul.f32 %v637_v27, %v231_v55 }
 0x10c   :  { %v641_v33 = vpop.eup %640  ;;  %254 = vadd.xlane.f32.xlu0 %v253_v28  ;;  %v246_v34 = vmul.f32 %v639_v30, %v227_v54 }
 0x10d   :  { %v643_v35 = vpop.eup %642  ;;  %266 = vadd.xlane.f32.xlu1 %v265_v31  ;;  %v256_v36 = vadd.f32 %v239_v32, %v238_v29  ;;  %v247_v37 = vmul.f32 %v641_v33, %v231_v55  ;;  %v309_v29 = vld [vmem:[%s913_s1 + $0x20] sm:$0xff]  ;;  %v307_v33 = vld [vmem:[%s913_s1 + $0x10] sm:$0xff] }
 0x10e   :  { %v645_v38 = vpop.eup %644  ;;  %v240_v39 = vmul.f32 %v643_v35, %v227_v54 }
 0x10f   :  { %v647_v40 = vpop.eup %646  ;;  %v241_v41 = vmul.f32 %v645_v38, %v231_v55  ;;  %v268_v42 = vadd.f32 %v247_v37, %v246_v34 }
 0x110   :  { %v649_v43 = vpop.eup %648  ;;  %263 = vadd.xlane.f32.xlu0 %v262_v22  ;;  %v248_v44 = vmul.f32 %v647_v40, %v227_v54 }
 0x111   :  { %257 = vadd.xlane.f32.xlu1 %v256_v36  ;;  %v259_v45 = vadd.f32 %v241_v41, %v240_v39  ;;  %v249_v46 = vmul.f32 %v649_v43, %v231_v55 }
 0x113   :  { %v271_v47 = vadd.f32 %v249_v46, %v248_v44  ;;  %v308_v46 = vld [vmem:[%s913_s1 + $0x18] sm:$0xff] }
 0x114   :  { %269 = vadd.xlane.f32.xlu0 %v268_v42  ;;  %v311_v42 = vld [vmem:[%s913_s1 + $0x30] sm:$0xff] }
 0x115   :  { %260 = vadd.xlane.f32.xlu1 %v259_v45 }
 0x119   :  { %272 = vadd.xlane.f32.xlu1 %v271_v47 }
 0x194   :  { %v252_v50 = vpop.xlane.xlu0 %251 }
 0x195   :  { %v281_v51 = vadd.f32 %v595_v49, %v252_v50 }
 0x197   :  { %v289_v52 = vmul.f32 1.442695, %v281_v51 }
 0x199   :  { %650 = vpow2.f32 %v289_v52  ;;  %v255_v53 = vpop.xlane.xlu0 %254 }
 0x19a   :  { %v267_v56 = vpop.xlane.xlu1 %266  ;;  %v282_v57 = vadd.f32 %v595_v49, %v255_v53 }
 0x19b   :  { %v286_v58 = vadd.f32 %v595_v49, %v267_v56 }
 0x19c   :  { %v291_v54 = vmul.f32 1.442695, %v282_v57 }
 0x19d   :  { %v299_v59 = vmul.f32 1.442695, %v286_v58  ;;  %v264_v60 = vpop.xlane.xlu0 %263 }
 0x19e   :  { %652 = vpow2.f32 %v291_v54  ;;  %v258_v55 = vpop.xlane.xlu1 %257  ;;  %v285_v61 = vadd.f32 %v595_v49, %v264_v60 }
 0x19f   :  { %654 = vpow2.f32 %v299_v59  ;;  %v283_v62 = vadd.f32 %v595_v49, %v258_v55 }
 0x1a0   :  { %v297_v63 = vmul.f32 1.442695, %v285_v61 }
 0x1a1   :  { %v293_v0 = vmul.f32 1.442695, %v283_v62  ;;  %v270_v1 = vpop.xlane.xlu0 %269  ;;  %v312_v62 = vld [vmem:[%s913_s1 + $0x38] sm:$0xff] }
 0x1a2   :  { %656 = vpow2.f32 %v297_v63  ;;  %v261_v3 = vpop.xlane.xlu1 %260  ;;  %v287_v4 = vadd.f32 %v595_v49, %v270_v1 }
 0x1a3   :  { %v651_v5 = vpop.eup %650  ;;  %658 = vpow2.f32 %v293_v0  ;;  %v284_v6 = vadd.f32 %v595_v49, %v261_v3 }
 0x1a4   :  { %v301_v7 = vmul.f32 1.442695, %v287_v4  ;;  %v313_v8 = vmul.f32 %v651_v5, %v305_v2 }
 0x1a5   :  { %v295_v9 = vmul.f32 1.442695, %v284_v6 }
 0x1a6   :  { %660 = vpow2.f32 %v301_v7  ;;  %v273_v10 = vpop.xlane.xlu1 %272  ;;  %323 = vperm.xlu0 %616, %v313_v8   ;;  %v426_v11 = vsel %vm425_vm1, %v313_v8, 0.0 }
 0x1a7   :  { %662 = vpow2.f32 %v295_v9  ;;  %v288_v13 = vadd.f32 %v595_v49, %v273_v10  ;;  %v427_v22 = vrot.slane %v426_v11, 4 }
 0x1a8   :  { %v653_v24 = vpop.eup %652 }
 0x1a9   :  { %v655_v25 = vpop.eup %654  ;;  %v303_v26 = vmul.f32 1.442695, %v288_v13  ;;  %v428_v27 = vadd.f32 %v427_v22, %v426_v11  ;;  %v314_v28 = vmul.f32 %v653_v24, %v306_v12 }
 0x1aa   :  { %v318_v30 = vmul.f32 %v655_v25, %v310_v23 }
 0x1ab   :  { %664 = vpow2.f32 %v303_v26  ;;  %v429_v31 = vrot.slane %v428_v27, 2  ;;  %v433_v32 = vsel %vm425_vm1, %v314_v28, 0.0 }
 0x1ac   :  { %v657_v34 = vpop.eup %656  ;;  %v434_v35 = vrot.slane %v433_v32, 4  ;;  %v461_v36 = vsel %vm425_vm1, %v318_v30, 0.0 }
 0x1ad   :  { %v659_v37 = vpop.eup %658  ;;  %v317_v38 = vmul.f32 %v657_v34, %v309_v29  ;;  %v462_v39 = vrot.slane %v461_v36, 4  ;;  %v430_v43 = vadd.f32 %v429_v31, %v428_v27 }
 0x1ae   :  { %v435_v40 = vadd.f32 %v434_v35, %v433_v32  ;;  %v315_v41 = vmul.f32 %v659_v37, %v307_v33 }
 0x1af   :  { %343 = vperm.xlu1 %617, %v317_v38   ;;  %v454_v44 = vsel %vm425_vm1, %v317_v38, 0.0  ;;  %v463_v45 = vadd.f32 %v462_v39, %v461_v36  ;;  %v431_v59 = vrot.slane %v430_v43, 1 }
 0x1b0   :  { %v661_v47 = vpop.eup %660  ;;  %v455_v48 = vrot.slane %v454_v44, 4  ;;  %v436_v49 = vrot.slane %v435_v40, 2  ;;  %v440_v50 = vsel %vm425_vm1, %v315_v41, 0.0 }
 0x1b1   :  { %v663_v51 = vpop.eup %662  ;;  %v464_v52 = vrot.slane %v463_v45, 2  ;;  %v441_v53 = vrot.slane %v440_v50, 4  ;;  %v319_v56 = vmul.f32 %v661_v47, %v311_v42  ;;  %v432_v11 = vadd.f32 %v431_v59, %v430_v43 }
 0x1b2   :  { %v456_v57 = vadd.f32 %v455_v48, %v454_v44  ;;  %v437_v58 = vadd.f32 %v436_v49, %v435_v40  ;;  %v316_v54 = vmul.f32 %v663_v51, %v308_v46 }
 0x1b3   :  { %328 = vperm.xlu1 %617, %v314_v28   ;;  %v465_v60 = vadd.f32 %v464_v52, %v463_v45  ;;  %v442_v55 = vadd.f32 %v441_v53, %v440_v50  ;;  %v468_v61 = vsel %vm425_vm1, %v319_v56, 0.0  ;;  %v482_v33 = vadd.f32 1e-08, %v432_v11 }
 0x1b4   :  { %v457_v63 = vrot.slane %v456_v57, 2  ;;  %v438_v0 = vrot.slane %v437_v58, 1  ;;  %v469_v1 = vrot.slane %v468_v61, 4  ;;  %v447_v2 = vsel %vm425_vm1, %v316_v54, 0.0 }
 0x1b5   :  { %v665_v3 = vpop.eup %664  ;;  %v466_v4 = vrot.slane %v465_v60, 1  ;;  %v443_v5 = vrot.slane %v442_v55, 2  ;;  %v448_v6 = vrot.slane %v447_v2, 4 }
 0x1b6   :  { %v458_v7 = vadd.f32 %v457_v63, %v456_v57  ;;  %v439_v8 = vadd.f32 %v438_v0, %v437_v58  ;;  %v470_v9 = vadd.f32 %v469_v1, %v468_v61  ;;  %v320_v10 = vmul.f32 %v665_v3, %v312_v62 }
 0x1b7   :  { %v467_v12 = vadd.f32 %v466_v4, %v465_v60  ;;  %348 = vperm.xlu1 %617, %v318_v30   ;;  %v444_v13 = vadd.f32 %v443_v5, %v442_v55  ;;  %v449_v22 = vadd.f32 %v448_v6, %v447_v2 }
 0x1b8   :  { %v459_v23 = vrot.slane %v458_v7, 1  ;;  %v483_v24 = vadd.f32 1e-08, %v439_v8  ;;  %v471_v25 = vrot.slane %v470_v9, 2  ;;  %v475_v26 = vsel %vm425_vm1, %v320_v10, 0.0 }
 0x1b9   :  { %v450_v27 = vrot.slane %v449_v22, 2  ;;  %v476_v28 = vrot.slane %v475_v26, 4  ;;  %v487_v29 = vadd.f32 1e-08, %v467_v12  ;;  %v445_v35 = vrot.slane %v444_v13, 1 }
 0x1ba   :  { %666 = vrcp.f32 %v483_v24  ;;  %v460_v34 = vadd.f32 %v459_v23, %v458_v7  ;;  %v472_v36 = vadd.f32 %v471_v25, %v470_v9 }
 0x1bb   :  { %333 = vperm.xlu1 %617, %v315_v41   ;;  %v451_v31 = vadd.f32 %v450_v27, %v449_v22  ;;  %v477_v32 = vadd.f32 %v476_v28, %v475_v26  ;;  %668 = vrcp.f32 %v487_v29  ;;  %v446_v42 = vadd.f32 %v445_v35, %v444_v13 }
 0x1bc   :  { %670 = vrcp.f32 %v482_v33  ;;  %v486_v40 = vadd.f32 1e-08, %v460_v34  ;;  %v473_v43 = vrot.slane %v472_v36, 1 }
 0x1bd   :  { %v452_v37 = vrot.slane %v451_v31, 1  ;;  %v478_v30 = vrot.slane %v477_v32, 2  ;;  %v484_v47 = vadd.f32 1e-08, %v446_v42 }
 0x1be   :  { %v474_v48 = vadd.f32 %v473_v43, %v472_v36 }
 0x1bf   :  { %353 = vperm.xlu1 %617, %v319_v56   ;;  %v453_v38 = vadd.f32 %v452_v37, %v451_v31  ;;  %v479_v39 = vadd.f32 %v478_v30, %v477_v32 }
 0x1c0   :  { %v488_v51 = vadd.f32 1e-08, %v474_v48 }
 0x1c1   :  { %v485_v44 = vadd.f32 1e-08, %v453_v38  ;;  %v480_v45 = vrot.slane %v479_v39, 1 }
 0x1c3   :  { %672 = vrcp.f32 %v485_v44  ;;  %338 = vperm.xlu1 %617, %v316_v54   ;;  %v481_v41 = vadd.f32 %v480_v45, %v479_v39 }
 0x1c4   :  { %v667_v46 = vpop.eup %666  ;;  %674 = vrcp.f32 %v486_v40 }
 0x1c5   :  { %505 = vperm.xlu0 %616, %v667_v46   ;;  %v489_v49 = vadd.f32 1e-08, %v481_v41  ;;  %v669_v50 = vpop.eup %668 }
 0x1c6   :  { %v671_v52 = vpop.eup %670 }
 0x1c7   :  { %676 = vrcp.f32 %v489_v49  ;;  %358 = vperm.xlu1 %617, %v320_v10  }
 0x1c8   :  { %678 = vrcp.f32 %v484_v47 }
 0x1c9   :  { %525 = vperm.xlu0 %616, %v669_v50   ;;  %680 = vrcp.f32 %v488_v51 }
 0x1cb   :  { %500 = vperm.xlu1 %617, %v671_v52  }
 0x1cd   :  { %v673_v53 = vpop.eup %672 }
 0x1ce   :  { %v675_v56 = vpop.eup %674  ;;  %515 = vperm.xlu0 %616, %v673_v53  }
 0x1cf   :  { %520 = vperm.xlu1 %617, %v675_v56  }
 0x1d1   :  { %v677_v57 = vpop.eup %676 }
 0x1d2   :  { %v679_v58 = vpop.eup %678  ;;  %535 = vperm.xlu0 %616, %v677_v57  }
 0x1d3   :  { %510 = vperm.xlu1 %617, %v679_v58   ;;  %v681_v54 = vpop.eup %680 }
 0x1d7   :  { %530 = vperm.xlu1 %617, %v681_v54  }
 0x225   :  { %v324_v60 = vpop.permute.xlu0 %323 }
 0x226   :  { %v361_v61 = vmul.f32 %v324_v60, %v791_v14 }
 0x228   :  { %v369_v0 = vsel %vm68_vm0, %v361_v61, 0.0 }
 0x229   :  { %v370_v4 = vrot.slane %v369_v0, 4 }
 0x22b   :  { %v371_v9 = vadd.f32 %v370_v4, %v369_v0 }
 0x22d   :  { %v372_v24 = vrot.slane %v371_v9, 2 }
 0x22e   :  { %v344_v59 = vpop.permute.xlu1 %343 }
 0x22f   :  { %v365_v1 = vmul.f32 %v344_v59, %v796_v15 }
 0x231   :  { %v397_v8 = vsel %vm68_vm0, %v365_v1, 0.0 }
 0x232   :  { %v329_v55 = vpop.permute.xlu1 %328  ;;  %v398_v12 = vrot.slane %v397_v8, 4 }
 0x233   :  { %v362_v62 = vmul.f32 %v329_v55, %v805_v16 }
 0x234   :  { %v399_v26 = vadd.f32 %v398_v12, %v397_v8 }
 0x235   :  { %v376_v2 = vsel %vm68_vm0, %v362_v62, 0.0 }
 0x236   :  { %v349_v63 = vpop.permute.xlu1 %348  ;;  %v377_v6 = vrot.slane %v376_v2, 4  ;;  %v400_v37 = vrot.slane %v399_v26, 2 }
 0x237   :  { %v366_v3 = vmul.f32 %v349_v63, %v810_v17 }
 0x238   :  { %v378_v15 = vadd.f32 %v377_v6, %v376_v2  ;;  %v401_v49 = vadd.f32 %v400_v37, %v399_v26 }
 0x239   :  { %v404_v14 = vsel %vm68_vm0, %v366_v3, 0.0 }
 0x23a   :  { %v334_v5 = vpop.permute.xlu1 %333  ;;  %v405_v22 = vrot.slane %v404_v14, 4  ;;  %v379_v27 = vrot.slane %v378_v15, 2  ;;  %v402_v60 = vrot.slane %v401_v49, 1 }
 0x23b   :  { %v363_v7 = vmul.f32 %v334_v5, %v819_v18 }
 0x23c   :  { %v406_v29 = vadd.f32 %v405_v22, %v404_v14  ;;  %v380_v30 = vadd.f32 %v379_v27, %v378_v15  ;;  %v403_v6 = vadd.f32 %v402_v60, %v401_v49 }
 0x23d   :  { %v383_v16 = vsel %vm68_vm0, %v363_v7, 0.0 }
 0x23e   :  { %v384_v10 = vrot.slane %v383_v16, 4  ;;  %v354_v11 = vpop.permute.xlu1 %353  ;;  %v407_v39 = vrot.slane %v406_v29, 2  ;;  %v381_v47 = vrot.slane %v380_v30, 1 }
 0x23f   :  { %v367_v13 = vmul.f32 %v354_v11, %v824_v19  ;;  %v373_v19 = vadd.f32 %v372_v24, %v371_v9 }
 0x240   :  { %v385_v17 = vadd.f32 %v384_v10, %v383_v16  ;;  %v408_v51 = vadd.f32 %v407_v39, %v406_v29  ;;  %v382_v59 = vadd.f32 %v381_v47, %v380_v30 }
 0x241   :  { %v411_v23 = vsel %vm68_vm0, %v367_v13, 0.0  ;;  %v374_v46 = vrot.slane %v373_v19, 1 }
 0x242   :  { %v412_v25 = vrot.slane %v411_v23, 4  ;;  %v339_v18 = vpop.permute.xlu1 %338  ;;  %v386_v31 = vrot.slane %v385_v17, 2  ;;  %v409_v55 = vrot.slane %v408_v51, 1 }
 0x243   :  { %v364_v28 = vmul.f32 %v339_v18, %v833_v20 }
 0x244   :  { %v413_v32 = vadd.f32 %v412_v25, %v411_v23  ;;  %v506_v34 = vpop.permute.xlu0 %505  ;;  %v387_v44 = vadd.f32 %v386_v31, %v385_v17  ;;  %v410_v8 = vadd.f32 %v409_v55, %v408_v51 }
 0x245   :  { %v390_v33 = vsel %vm68_vm0, %v364_v28, 0.0  ;;  %v539_v3 = vmul.f32 %v506_v34, %v382_v59 }
 0x246   :  { %v391_v35 = vrot.slane %v390_v33, 4  ;;  %v359_v36 = vpop.permute.xlu1 %358  ;;  %v414_v42 = vrot.slane %v413_v32, 2  ;;  %v388_v53 = vrot.slane %v387_v44, 1 }
 0x247   :  { %v368_v38 = vmul.f32 %v359_v36, %v838_v21  ;;  %v375_v21 = vadd.f32 %v374_v46, %v373_v19 }
 0x248   :  { %v392_v40 = vadd.f32 %v391_v35, %v390_v33  ;;  %v526_v48 = vpop.permute.xlu0 %525  ;;  %v415_v56 = vadd.f32 %v414_v42, %v413_v32  ;;  %v389_v1 = vadd.f32 %v388_v53, %v387_v44 }
 0x249   :  { %v418_v43 = vsel %vm68_vm0, %v368_v38, 0.0  ;;  %v543_v15 = vmul.f32 %v526_v48, %v410_v8 }
 0x24a   :  { %v393_v20 = vrot.slane %v392_v40, 2  ;;  %v419_v45 = vrot.slane %v418_v43, 4  ;;  %v501_v41 = vpop.permute.xlu1 %500  ;;  %v416_v2 = vrot.slane %v415_v56, 1 }
 0x24b   :  { %v538_v61 = vmul.f32 %v501_v41, %v375_v21 }
 0x24c   :  { %v420_v50 = vadd.f32 %v419_v45, %v418_v43  ;;  %v394_v52 = vadd.f32 %v393_v20, %v392_v40  ;;  %v417_v12 = vadd.f32 %v416_v2, %v415_v56 }
 0x24d   :  { %v516_v0 = vpop.permute.xlu0 %515  ;;  %v555_v14 = vsel %vm554_vm2, %v539_v3, %v538_v61 }
 0x24e   :  { %v421_v57 = vrot.slane %v420_v50, 2  ;;  %v395_v58 = vrot.slane %v394_v52, 1  ;;  %v521_v54 = vpop.permute.xlu1 %520 }
 0x24f   :  { %v542_v10 = vmul.f32 %v521_v54, %v403_v6 }
 0x250   :  { %v396_v62 = vadd.f32 %v395_v58, %v394_v52  ;;  %v422_v63 = vadd.f32 %v421_v57, %v420_v50 }
 0x251   :  { %v536_v17 = vpop.permute.xlu0 %535 }
 0x252   :  { %v423_v4 = vrot.slane %v422_v63, 1  ;;  %v511_v5 = vpop.permute.xlu1 %510  ;;  %v541_v16 = vmul.f32 %v516_v0, %v396_v62 }
 0x253   :  { %v540_v7 = vmul.f32 %v511_v5, %v389_v1 }
 0x254   :  { %v424_v9 = vadd.f32 %v423_v4, %v422_v63 }
 0x255   :  { %v557_v11 = vsel %vm556_vm3, %v540_v7, %v555_v14 }
 0x256   :  { %v559_v13 = vsel %vm558_vm4, %v541_v16, %v557_v11  ;;  %v531_v22 = vpop.permute.xlu1 %530  ;;  %v545_v25 = vmul.f32 %v536_v17, %v424_v9 }
 0x257   :  { %v544_v23 = vmul.f32 %v531_v22, %v417_v12  ;;  %v561_v24 = vsel %vm560_vm5, %v542_v10, %v559_v13 }
 0x258   :  { %v563_v18 = vsel %vm562_vm6, %v543_v15, %v561_v24 }
 0x259   :  { %v565_v26 = vsel %vm564_vm7, %v544_v23, %v563_v18 }
 0x25a   :  { %v567_v27 = vsel %vm566_vm8, %v545_v25, %v565_v26 }
 0x25b   :  { %569 = vst.msk [vmem:[#allocation6] sm:$0xff] %vm68_vm0, %v567_v27 }
 0x25c   :  { %574 = vsyncadd [#allocation5], 96  ;;  %s735_s1 = smov [#allocation6]  }
 0x25d   :  { %s575_s18 = sshll.u32 %s735_s1, 4  ;;  %s576_s18 = int_to_ptr.vmem [resolvable:$true] %s575_s18 }
 0x25e   :  { %s704_s19 = scalar_lea.vmem %s576_s18, 32  ;;  %s708_s20 = scalar_lea.vmem %s576_s18, 128 }
 0x25f   :  { %p705_p8 = scmp.ne.s32.totalorder %s576_s18, %s704_s19  ;;  %p709_p9 = scmp.lt.s32.totalorder %s576_s18, %s576_s18 }
 0x260   :  { %p710_p10 = scmp.lt.s32.totalorder %s708_s20, %s704_s19 }
 0x262   :  { %p711_p11 = por %p710_p10, %p709_p9 }
 0x264   :  { %p712_p12 = pnand %p711_p11, %p705_p8 }
 0x266   :  { %715 = shalt.err (!%p712_p12)
}
 0x267   :  { %s716_s23 = scalar_lea.hbm %s918_s6, 32 }
 0x268   :  { %p717_p13 = scmp.ne.s32.totalorder %s918_s6, %s716_s23  ;;  %p720_p0 = scmp.lt.u32.totalorder %s716_s23, %s918_s6 }
 0x26a   :  { %p722_p1 = pnand %p720_p0, %p717_p13 }
 0x26c   :  { %725 = shalt.err (!%p722_p1)
}
 0x26d   :  { %s736_s28 = smov 32   ;;  %s737_s0 = smov 2  }
 0x26e   :  { %581 = dma.vmem_to_hbm [thread:$0]  %s576_s18, 32, %s918_s6, [#allocation5], %s736_s28, %s736_s28, %s737_s0  }
 0x26f   :  { %728 = dma.done.wait [#allocation5], 128  }
 0x270   :  { %729 = vsyncadd [#allocation5], 4294967168 }
 0x271   :  { %585 = vsyncpa [#allocation4], 1 }
 0x272   :  { %586 = vsyncpa [#allocation5], 1 }

</bundles_post_ra>
